<compile_context>
chip_gen: v7x
topology: tpu7x:2x2x1
jax: 0.10.0
libtpu: 0.0.40
codegen_flags: <defaults>
</compile_context>

<pallas_src>
import functools
import math

import jax
import jax.numpy as jnp
import numpy as np
from jax.experimental import pallas as pl
from jax.experimental.pallas import tpu as pltpu


# ----------------------------- small helpers -------------------------------

def _round_up(x, m):
    return ((x + m - 1) // m) * m


def _pick_tile(dim, desired, align):
    """Largest multiple of `align` that divides `dim` and is <= `desired`;
    falls back to the (always legal) full dimension."""
    if dim <= desired:
        return dim
    t = (desired // align) * align
    while t >= align:
        if dim % t == 0:
            return t
        t -= align
    return dim


def _vmem_limit_bytes(blocks):
    """Scoped-VMEM request derived from actual block bytes (double-buffered + headroom),
    capped at 48 MiB so v7x's 64 MiB physical VMEM keeps compiler headroom."""
    total = 0
    for shape, dtype in blocks:
        total += math.prod(shape) * np.dtype(dtype).itemsize
    return int(min(48 * 1024 * 1024, max(32 * 1024 * 1024, 3 * total)))


# --------------------------- fused matmul kernel ----------------------------
# out = act(LN(x) @ w + bias) + residual    (each piece optional)
# LN fusion requires tk == K (whole rows in the x tile), which the wrapper enforces.

def _make_mm_kernel(has_ln, has_bias, has_res, act, single_k):
    def kernel(*refs):
        idx = 0
        x_ref = refs[idx]; idx += 1
        w_ref = refs[idx]; idx += 1
        g_ref = bln_ref = b_ref = r_ref = None
        if has_ln:
            g_ref, bln_ref = refs[idx], refs[idx + 1]; idx += 2
        if has_bias:
            b_ref = refs[idx]; idx += 1
        if has_res:
            r_ref = refs[idx]; idx += 1
        o_ref = refs[idx]; idx += 1
        acc_ref = None if single_k else refs[idx]

        x = x_ref[...]
        if has_ln:
            xf = x.astype(jnp.float32)
            mu = jnp.mean(xf, axis=-1, keepdims=True)
            var = jnp.mean(jnp.square(xf - mu), axis=-1, keepdims=True)
            xf = (xf - mu) * jax.lax.rsqrt(var + 1e-5)
            x = (xf * g_ref[...] + bln_ref[...]).astype(w_ref.dtype)

        part = jnp.dot(x, w_ref[...], preferred_element_type=jnp.float32)

        def finish(y):
            if has_bias:
                y = y + b_ref[...].astype(jnp.float32)
            if act == "quick_gelu":
                y = y * jax.nn.sigmoid(1.702 * y)
            if has_res:
                y = y + r_ref[...].astype(jnp.float32)
            o_ref[...] = y.astype(o_ref.dtype)

        if single_k:
            finish(part)
        else:
            @pl.when(pl.program_id(2) == 0)
            def _():
                acc_ref[...] = jnp.zeros_like(acc_ref)

            acc_ref[...] += part

            @pl.when(pl.program_id(2) == pl.num_programs(2) - 1)
            def _():
                finish(acc_ref[...])

    return kernel


def matmul_fused(x, w, bias=None, residual=None, act=None, ln_g=None, ln_b=None,
                 out_dtype=None, tm=256, tn=512, tk=2048):
    """Tiled MXU matmul with optional fused LayerNorm prologue and
    bias / quick-GELU / residual epilogue. f32 accumulation."""
    M, K = x.shape
    N = w.shape[1]
    has_ln = ln_g is not None
    tm = _pick_tile(M, tm, 16)
    tn = _pick_tile(N, tn, 128)
    tk = K if has_ln else _pick_tile(K, tk, 128)
    grid = (M // tm, N // tn, K // tk)
    single_k = grid[2] == 1

    in_specs = [pl.BlockSpec((tm, tk), lambda i, j, k: (i, k)),
                pl.BlockSpec((tk, tn), lambda i, j, k: (k, j))]
    args = [x, w]
    blocks = [((tm, tk), x.dtype), ((tk, tn), w.dtype)]
    if has_ln:
        in_specs += [pl.BlockSpec((1, K), lambda i, j, k: (0, 0)),
                     pl.BlockSpec((1, K), lambda i, j, k: (0, 0))]
        args += [ln_g, ln_b]
        blocks += [((1, K), ln_g.dtype), ((1, K), ln_b.dtype)]
    if bias is not None:
        in_specs.append(pl.BlockSpec((1, tn), lambda i, j, k: (0, j)))
        args.append(bias)
        blocks.append(((1, tn), bias.dtype))
    if residual is not None:
        # TODO(synk): consider pipeline_mode=pl.Buffered(3) on weight specs for the
        # weight-streaming fc1/fc2 regime on v5e/v6e.
        in_specs.append(pl.BlockSpec((tm, tn), lambda i, j, k: (i, j)))
        args.append(residual)
        blocks.append(((tm, tn), residual.dtype))

    out_dtype = out_dtype or x.dtype
    blocks.append(((tm, tn), out_dtype))
    scratch = []
    if not single_k:
        scratch = [pltpu.VMEM((tm, tn), jnp.float32)]
        blocks.append(((tm, tn), jnp.float32))

    kern = _make_mm_kernel(has_ln, bias is not None, residual is not None, act, single_k)
    return pl.pallas_call(
        kern,
        grid=grid,
        in_specs=in_specs,
        out_specs=pl.BlockSpec((tm, tn), lambda i, j, k: (i, j)),
        out_shape=jax.ShapeDtypeStruct((M, N), out_dtype),
        scratch_shapes=scratch,
        compiler_params=pltpu.CompilerParams(
            dimension_semantics=("parallel", "parallel", "arbitrary"),
            vmem_limit_bytes=_vmem_limit_bytes(blocks)),
    )(*args)


# ---------------- fused (CLS/pos add + pre-LayerNorm) kernel -----------------

def _add_pos_ln_kernel(x_ref, p_ref, g_ref, b_ref, o_ref):
    x = x_ref[...].astype(jnp.float32) + p_ref[...].astype(jnp.float32)
    mu = jnp.mean(x, axis=-1, keepdims=True)
    var = jnp.mean(jnp.square(x - mu), axis=-1, keepdims=True)
    y = (x - mu) * jax.lax.rsqrt(var + 1e-5)
    o_ref[...] = (y * g_ref[...] + b_ref[...]).astype(o_ref.dtype)


def add_pos_layernorm(tokens, pos, g, b):
    # tokens: [B, S, D]; pos: [1, S, D]; g, b: [1, 1, D]
    B, S, D = tokens.shape
    return pl.pallas_call(
        _add_pos_ln_kernel,
        grid=(B,),
        in_specs=[pl.BlockSpec((1, S, D), lambda i: (i, 0, 0)),
                  pl.BlockSpec((1, S, D), lambda i: (0, 0, 0)),
                  pl.BlockSpec((1, 1, D), lambda i: (0, 0, 0)),
                  pl.BlockSpec((1, 1, D), lambda i: (0, 0, 0))],
        out_specs=pl.BlockSpec((1, S, D), lambda i: (i, 0, 0)),
        out_shape=jax.ShapeDtypeStruct((B, S, D), tokens.dtype),
        compiler_params=pltpu.CompilerParams(dimension_semantics=("parallel",)),
    )(tokens, pos, g, b)


# ------------------------------- attention ----------------------------------
# Reads Q/K/V straight out of the fused [B, S, 3D] projection buffer and writes a
# lane-dense [B, S, D] output (head h -> columns h*Dh:(h+1)*Dh): no XLA transposes.
# Padded key columns (>= s_real) are masked before the softmax.
# 1/sqrt(Dh) is pre-folded into the Q projection weights.

def _make_attn_kernel(H, Dh, D, s_real, s_pad):
    def kernel(qkv_ref, o_ref):
        qkv = qkv_ref[0]                                    # [S, 3D] bf16
        if s_pad > s_real:
            key_mask = jax.lax.broadcasted_iota(jnp.int32, (s_pad, s_pad), 1) < s_real
        outs = []
        for h in range(H):                                  # static, unrolled
            q = qkv[:, h * Dh:(h + 1) * Dh]
            k = qkv[:, D + h * Dh:D + (h + 1) * Dh]
            v = qkv[:, 2 * D + h * Dh:2 * D + (h + 1) * Dh]
            s = jax.lax.dot_general(q, k, (((1,), (1,)), ((), ())),
                                    preferred_element_type=jnp.float32)   # [S, S]
            if s_pad > s_real:
                s = jnp.where(key_mask, s, -1e30)
            s = s - jnp.max(s, axis=-1, keepdims=True)
            p = jnp.exp(s)
            p = p * pl.reciprocal(jnp.sum(p, axis=-1, keepdims=True), approx=True)
            outs.append(jnp.dot(p.astype(v.dtype), v,
                                preferred_element_type=jnp.float32))      # [S, Dh]
        o_ref[0] = jnp.concatenate(outs, axis=-1).astype(o_ref.dtype)     # [S, D]
    return kernel
    # TODO(synk): split the grid over (batch, head-group) when Dh divides 128 so
    # v7x's two TensorCores get >=2 parallel grid points even at B=1.


def attention(qkv3, num_heads, s_real):
    # qkv3: [B, S, 3D] (S possibly padded past s_real)
    B, S, threeD = qkv3.shape
    D = threeD // 3
    Dh = D // num_heads
    kern = _make_attn_kernel(num_heads, Dh, D, s_real, S)
    return pl.pallas_call(
        kern,
        grid=(B,),
        in_specs=[pl.BlockSpec((1, S, 3 * D), lambda b: (b, 0, 0))],
        out_specs=pl.BlockSpec((1, S, D), lambda b: (b, 0, 0)),
        out_shape=jax.ShapeDtypeStruct((B, S, D), qkv3.dtype),
        compiler_params=pltpu.CompilerParams(dimension_semantics=("parallel",)),
    )(qkv3)


# ----------------------------- Parameter init ------------------------------

def init_params(key, *, C, ps, D, mlp, layers, num_heads, num_pos, n_out):
    keys = jax.random.split(key, 6 + layers)
    scale = (D // num_heads) ** -0.5
    kp_pad = _round_up(C * ps * ps, 128)       # padded patch contraction dim
    n_out_pad = _round_up(n_out, 128)          # lane-dense classifier head

    def nrm(k, shape):
        return jax.random.normal(k, shape, jnp.float32) * 0.02

    params = {
        "patch_w": nrm(keys[0], (kp_pad, D)).astype(jnp.bfloat16),   # conv (bias=False)
        "cls": nrm(keys[1], (D,)),
        "pos": nrm(keys[2], (num_pos, D)).reshape(1, num_pos, D),
        "pre_ln_g": jnp.ones((1, 1, D), jnp.float32),
        "pre_ln_b": jnp.zeros((1, 1, D), jnp.float32),
        "head_w": nrm(keys[3], (D, n_out_pad)).astype(jnp.bfloat16),
        "head_b": jnp.zeros((1, n_out_pad), jnp.float32),
        "layers": [],
    }
    for l in range(layers):
        lk = jax.random.split(keys[6 + l], 6)
        q_w, k_w, v_w = nrm(lk[0], (D, D)), nrm(lk[1], (D, D)), nrm(lk[2], (D, D))
        q_b = k_b = v_b = jnp.zeros((D,), jnp.float32)
        # Fused QKV projection; softmax scale folded into the Q slice.
        qkv_w = jnp.concatenate([q_w * scale, k_w, v_w], axis=1).astype(jnp.bfloat16)
        qkv_b = jnp.concatenate([q_b * scale, k_b, v_b]).reshape(1, 3 * D)
        params["layers"].append(dict(
            ln1_g=jnp.ones((1, D), jnp.float32), ln1_b=jnp.zeros((1, D), jnp.float32),
            qkv_w=qkv_w, qkv_b=qkv_b,
            o_w=nrm(lk[3], (D, D)).astype(jnp.bfloat16), o_b=jnp.zeros((1, D), jnp.float32),
            ln2_g=jnp.ones((1, D), jnp.float32), ln2_b=jnp.zeros((1, D), jnp.float32),
            fc1_w=nrm(lk[4], (D, mlp)).astype(jnp.bfloat16), fc1_b=jnp.zeros((1, mlp), jnp.float32),
            fc2_w=nrm(lk[5], (mlp, D)).astype(jnp.bfloat16), fc2_b=jnp.zeros((1, D), jnp.float32),
        ))
    return params


# ------------------------------ Model forward ------------------------------

def clip_model_forward(params, x, *, ps, num_heads, n_out):
    # x: (B, 1, C, H, W) NCHW pixel values (extra dim squeezed like torch.squeeze)
    x = jnp.squeeze(x, axis=1)                         # (B, C, H, W) -- safe even for B == 1
    B, C, Hi, Wi = x.shape
    gh, gw = Hi // ps, Wi // ps
    S_real = gh * gw + 1
    S = _round_up(S_real, 16)                          # pad tokens: bounded, aligned tiles
    D = params["patch_w"].shape[1]
    kp = C * ps * ps
    kp_pad = params["patch_w"].shape[0]

    # --- patch embedding: stride=ps conv (bias=False) as a tiled Pallas matmul ---
    patches = (x.reshape(B, C, gh, ps, gw, ps)
                .transpose(0, 2, 4, 1, 3, 5)
                .reshape(B * gh * gw, kp)).astype(jnp.bfloat16)
    if kp_pad > kp:
        patches = jnp.pad(patches, ((0, 0), (0, kp_pad - kp)))   # zero pad -> exact result
    emb = matmul_fused(patches, params["patch_w"]).reshape(B, gh * gw, D)

    # --- prepend CLS token, pad sequence, fused (pos-add + pre_layernorm) kernel ---
    cls = jnp.broadcast_to(params["cls"].astype(emb.dtype).reshape(1, 1, D), (B, 1, D))
    tokens = jnp.concatenate([cls, emb], axis=1)                 # [B, S_real, D]
    if S > S_real:
        tokens = jnp.pad(tokens, ((0, 0), (0, S - S_real), (0, 0)))
    pos = params["pos"]
    if S > pos.shape[1]:
        pos = jnp.pad(pos, ((0, 0), (0, S - pos.shape[1]), (0, 0)))
    h = add_pos_layernorm(tokens, pos, params["pre_ln_g"], params["pre_ln_b"])  # [B, S, D]

    M = B * S
    tm_rows = S if M > 512 else M          # S divides M -> always a legal, bounded row tile
    h2d = h.reshape(M, D)

    # --- encoder layers (pre-LN transformer, quick-GELU MLP) ---
    for lp in params["layers"]:
        # attention block: LN fused into the QKV matmul prologue, no XLA transposes
        qkv = matmul_fused(h2d, lp["qkv_w"], lp["qkv_b"],
                           ln_g=lp["ln1_g"], ln_b=lp["ln1_b"], tm=tm_rows)      # [M, 3D]
        a = attention(qkv.reshape(B, S, 3 * D), num_heads, S_real)              # [B, S, D]
        h2d = matmul_fused(a.reshape(M, D), lp["o_w"], lp["o_b"],
                           residual=h2d, tm=tm_rows)                            # residual fused

        # MLP block: LN + bias + quick-GELU fused in fc1, residual fused in fc2
        t = matmul_fused(h2d, lp["fc1_w"], lp["fc1_b"], act="quick_gelu",
                         ln_g=lp["ln2_g"], ln_b=lp["ln2_b"], tm=tm_rows)
        h2d = matmul_fused(t, lp["fc2_w"], lp["fc2_b"], residual=h2d, tm=tm_rows)

    # last_hidden_state[:, 0, :]  (HF last_hidden_state has no post_layernorm applied)
    cls_tok = h2d.reshape(B, S, D)[:, 0, :]
    # classification head (nn.Sequential(nn.Linear)); sigmoid is never applied in forward.
    # Head weight stored lane-padded to 128 columns; slice back to n_out.
    logits = matmul_fused(cls_tok, params["head_w"], params["head_b"],
                          out_dtype=jnp.float32)
    return logits[:, :n_out]


# ---------------------------------- Main -----------------------------------

if __name__ == "__main__":
    B, C, IMG, PS = 2, 3, 16, 8
    D, HEADS, MLP, LAYERS, N_OUT = 32, 4, 64, 2, 4
    NUM_POS = (IMG // PS) ** 2 + 1

    key = jax.random.PRNGKey(0)
    pkey, xkey = jax.random.split(key)
    params = init_params(pkey, C=C, ps=PS, D=D, mlp=MLP, layers=LAYERS,
                         num_heads=HEADS, num_pos=NUM_POS, n_out=N_OUT)

    # (B, 1, C, H, W) — extra singleton dim, squeezed inside forward like the PyTorch module
    x = jax.random.normal(xkey, (B, 1, C, IMG, IMG), jnp.float32)

    fwd = jax.jit(functools.partial(clip_model_forward, ps=PS, num_heads=HEADS, n_out=N_OUT))
    out = fwd(params, x)
    jax.block_until_ready(out)
    assert out.shape == (B, N_OUT), out.shape
    assert bool(jnp.all(jnp.isfinite(out)))
    print("KERNEL_OK")
</pallas_src>

<mosaic_0001>
module attributes {stable_mosaic.version = 11 : i64} {
  func.func @kernel(%arg0: i32, %arg1: i32, %arg2: i32, %arg3: memref<8x256xbf16, #tpu.memory_space<vmem>>, %arg4: memref<256x32xbf16, #tpu.memory_space<vmem>>, %arg5: memref<8x32xbf16, #tpu.memory_space<vmem>>) attributes {dimension_semantics = [#tpu.dimension_semantics<parallel>, #tpu.dimension_semantics<parallel>, #tpu.dimension_semantics<arbitrary>], iteration_bounds = array<i64: 1, 1, 1>, scalar_prefetch = 0 : i64, scratch_operands = 0 : i64, tpu.core_type = #tpu.core_type<tc>, window_params = [{transform_indices = @transform_0, window_bounds = array<i64: 8, 256>}, {transform_indices = @transform_1, window_bounds = array<i64: 256, 32>}, {transform_indices = @transform_2, window_bounds = array<i64: 8, 32>}]} {
    %c0 = arith.constant 0 : index
    %c0_0 = arith.constant 0 : index
    %0 = vector.load %arg3[%c0, %c0_0] : memref<8x256xbf16, #tpu.memory_space<vmem>>, vector<8x256xbf16>
    %c0_1 = arith.constant 0 : index
    %c0_2 = arith.constant 0 : index
    %1 = vector.load %arg4[%c0_1, %c0_2] : memref<256x32xbf16, #tpu.memory_space<vmem>>, vector<256x32xbf16>
    %cst = arith.constant dense<0.000000e+00> : vector<8x32xf32>
    %2 = tpu.matmul %0, %1, %cst {dimension_numbers = #tpu.dot_dimension_numbers<[1], [0], [0], [1], [0, 0, 1, 1], [], []>} : vector<8x256xbf16>, vector<256x32xbf16>, vector<8x32xf32> -> vector<8x32xf32>
    %3 = arith.truncf %2 : vector<8x32xf32> to vector<8x32xbf16>
    %c0_3 = arith.constant 0 : index
    %c0_4 = arith.constant 0 : index
    %4 = vector.load %arg5[%c0_3, %c0_4] : memref<8x32xbf16, #tpu.memory_space<vmem>>, vector<8x32xbf16>
    tpu.vector_store %arg5[%c0_3, %c0_4], %3 {strides = array<i32>} : memref<8x32xbf16, #tpu.memory_space<vmem>>, vector<8x32xbf16>,
    return
  }
  func.func @transform_0(%arg0: i32, %arg1: i32, %arg2: i32) -> (i32, i32) {
    %c0_i32 = arith.constant 0 : i32
    return %arg0, %arg2 : i32, i32
  }
  func.func @transform_1(%arg0: i32, %arg1: i32, %arg2: i32) -> (i32, i32) {
    %c0_i32 = arith.constant 0 : i32
    return %arg2, %arg1 : i32, i32
  }
  func.func @transform_2(%arg0: i32, %arg1: i32, %arg2: i32) -> (i32, i32) {
    %c0_i32 = arith.constant 0 : i32
    return %arg0, %arg1 : i32, i32
  }
}

module attributes {stable_mosaic.version = 11 : i64} {
  func.func @kernel(%arg0: i32, %arg1: i32, %arg2: i32, %arg3: memref<32x32xbf16, #tpu.memory_space<vmem>>, %arg4: memref<32x96xbf16, #tpu.memory_space<vmem>>, %arg5: memref<1x32xf32, #tpu.memory_space<vmem>>, %arg6: memref<1x32xf32, #tpu.memory_space<vmem>>, %arg7: memref<1x96xf32, #tpu.memory_space<vmem>>, %arg8: memref<32x96xbf16, #tpu.memory_space<vmem>>) attributes {dimension_semantics = [#tpu.dimension_semantics<parallel>, #tpu.dimension_semantics<parallel>, #tpu.dimension_semantics<arbitrary>], iteration_bounds = array<i64: 1, 1, 1>, scalar_prefetch = 0 : i64, scratch_operands = 0 : i64, tpu.core_type = #tpu.core_type<tc>, window_params = [{transform_indices = @transform_0, window_bounds = array<i64: 32, 32>}, {transform_indices = @transform_1, window_bounds = array<i64: 32, 96>}, {pipeline_mode = #tpu.pipeline_mode<synchronous>, transform_indices = @transform_2, window_bounds = array<i64: 1, 32>}, {pipeline_mode = #tpu.pipeline_mode<synchronous>, transform_indices = @transform_3, window_bounds = array<i64: 1, 32>}, {transform_indices = @transform_4, window_bounds = array<i64: 1, 96>}, {transform_indices = @transform_5, window_bounds = array<i64: 32, 96>}]} {
    %c0 = arith.constant 0 : index
    %c0_0 = arith.constant 0 : index
    %0 = vector.load %arg3[%c0, %c0_0] : memref<32x32xbf16, #tpu.memory_space<vmem>>, vector<32x32xbf16>
    %1 = arith.extf %0 : vector<32x32xbf16> to vector<32x32xf32>
    %cst = arith.constant dense<0.000000e+00> : vector<32xf32>
    %2 = vector.multi_reduction <add>, %1, %cst [1] : vector<32x32xf32> to vector<32xf32>
    %3 = vector.shape_cast %2 : vector<32xf32> to vector<32x1xf32>
    %cst_1 = arith.constant 3.200000e+01 : f32
    %4 = vector.broadcast %cst_1 : f32 to vector<32x1xf32>
    %5 = arith.divf %3, %4 : vector<32x1xf32>
    %6 = vector.broadcast %5 : vector<32x1xf32> to vector<32x32xf32>
    %7 = arith.subf %1, %6 : vector<32x32xf32>
    %8 = arith.mulf %7, %7 : vector<32x32xf32>
    %cst_2 = arith.constant dense<0.000000e+00> : vector<32xf32>
    %9 = vector.multi_reduction <add>, %8, %cst_2 [1] : vector<32x32xf32> to vector<32xf32>
    %10 = vector.shape_cast %9 : vector<32xf32> to vector<32x1xf32>
    %cst_3 = arith.constant 3.200000e+01 : f32
    %11 = vector.broadcast %cst_3 : f32 to vector<32x1xf32>
    %12 = arith.divf %10, %11 : vector<32x1xf32>
    %13 = vector.broadcast %5 : vector<32x1xf32> to vector<32x32xf32>
    %14 = arith.subf %1, %13 : vector<32x32xf32>
    %cst_4 = arith.constant 9.99999974E-6 : f32
    %15 = vector.broadcast %cst_4 : f32 to vector<32x1xf32>
    %16 = arith.addf %12, %15 : vector<32x1xf32>
    %17 = math.rsqrt %16 : vector<32x1xf32>
    %18 = vector.broadcast %17 : vector<32x1xf32> to vector<32x32xf32>
    %19 = arith.mulf %14, %18 : vector<32x32xf32>
    %c0_5 = arith.constant 0 : index
    %c0_6 = arith.constant 0 : index
    %20 = vector.load %arg5[%c0_5, %c0_6] : memref<1x32xf32, #tpu.memory_space<vmem>>, vector<1x32xf32>
    %21 = vector.broadcast %20 : vector<1x32xf32> to vector<32x32xf32>
    %22 = arith.mulf %19, %21 : vector<32x32xf32>
    %c0_7 = arith.constant 0 : index
    %c0_8 = arith.constant 0 : index
    %23 = vector.load %arg6[%c0_7, %c0_8] : memref<1x32xf32, #tpu.memory_space<vmem>>, vector<1x32xf32>
    %24 = vector.broadcast %23 : vector<1x32xf32> to vector<32x32xf32>
    %25 = arith.addf %22, %24 : vector<32x32xf32>
    %26 = arith.truncf %25 : vector<32x32xf32> to vector<32x32xbf16>
    %c0_9 = arith.constant 0 : index
    %c0_10 = arith.constant 0 : index
    %27 = vector.load %arg4[%c0_9, %c0_10] : memref<32x96xbf16, #tpu.memory_space<vmem>>, vector<32x96xbf16>
    %cst_11 = arith.constant dense<0.000000e+00> : vector<32x96xf32>
    %28 = tpu.matmul %26, %27, %cst_11 {dimension_numbers = #tpu.dot_dimension_numbers<[1], [0], [0], [1], [0, 0, 1, 1], [], []>} : vector<32x32xbf16>, vector<32x96xbf16>, vector<32x96xf32> -> vector<32x96xf32>
    %c0_12 = arith.constant 0 : index
    %c0_13 = arith.constant 0 : index
    %29 = vector.load %arg7[%c0_12, %c0_13] : memref<1x96xf32, #tpu.memory_space<vmem>>, vector<1x96xf32>
    %30 = vector.broadcast %29 : vector<1x96xf32> to vector<32x96xf32>
    %31 = arith.addf %28, %30 : vector<32x96xf32>
    %32 = arith.truncf %31 : vector<32x96xf32> to vector<32x96xbf16>
    %c0_14 = arith.constant 0 : index
    %c0_15 = arith.constant 0 : index
    %33 = vector.load %arg8[%c0_14, %c0_15] : memref<32x96xbf16, #tpu.memory_space<vmem>>, vector<32x96xbf16>
    tpu.vector_store %arg8[%c0_14, %c0_15], %32 {strides = array<i32>} : memref<32x96xbf16, #tpu.memory_space<vmem>>, vector<32x96xbf16>,
    return
  }
  func.func @transform_0(%arg0: i32, %arg1: i32, %arg2: i32) -> (i32, i32) {
    %c0_i32 = arith.constant 0 : i32
    return %arg0, %arg2 : i32, i32
  }
  func.func @transform_1(%arg0: i32, %arg1: i32, %arg2: i32) -> (i32, i32) {
    %c0_i32 = arith.constant 0 : i32
    return %arg2, %arg1 : i32, i32
  }
  func.func @transform_2(%arg0: i32, %arg1: i32, %arg2: i32) -> (i32, i32) {
    %c0_i32 = arith.constant 0 : i32
    %c0_i32_0 = arith.constant 0 : i32
    %c0_i32_1 = arith.constant 0 : i32
    return %c0_i32, %c0_i32_0 : i32, i32
  }
  func.func @transform_3(%arg0: i32, %arg1: i32, %arg2: i32) -> (i32, i32) {
    %c0_i32 = arith.constant 0 : i32
    %c0_i32_0 = arith.constant 0 : i32
    %c0_i32_1 = arith.constant 0 : i32
    return %c0_i32, %c0_i32_0 : i32, i32
  }
  func.func @transform_4(%arg0: i32, %arg1: i32, %arg2: i32) -> (i32, i32) {
    %c0_i32 = arith.constant 0 : i32
    %c0_i32_0 = arith.constant 0 : i32
    return %c0_i32, %arg1 : i32, i32
  }
  func.func @transform_5(%arg0: i32, %arg1: i32, %arg2: i32) -> (i32, i32) {
    %c0_i32 = arith.constant 0 : i32
    return %arg0, %arg1 : i32, i32
  }
}

module attributes {stable_mosaic.version = 11 : i64} {
  func.func @_add_pos_ln_kernel(%arg0: i32, %arg1: memref<1x16x32xbf16, #tpu.memory_space<vmem>>, %arg2: memref<1x16x32xf32, #tpu.memory_space<vmem>>, %arg3: memref<1x1x32xf32, #tpu.memory_space<vmem>>, %arg4: memref<1x1x32xf32, #tpu.memory_space<vmem>>, %arg5: memref<1x16x32xbf16, #tpu.memory_space<vmem>>) attributes {dimension_semantics = [#tpu.dimension_semantics<parallel>], iteration_bounds = array<i64: 2>, scalar_prefetch = 0 : i64, scratch_operands = 0 : i64, tpu.core_type = #tpu.core_type<tc>, window_params = [{transform_indices = @transform_0, window_bounds = array<i64: 1, 16, 32>}, {pipeline_mode = #tpu.pipeline_mode<synchronous>, transform_indices = @transform_1, window_bounds = array<i64: 1, 16, 32>}, {pipeline_mode = #tpu.pipeline_mode<synchronous>, transform_indices = @transform_2, window_bounds = array<i64: 1, 1, 32>}, {pipeline_mode = #tpu.pipeline_mode<synchronous>, transform_indices = @transform_3, window_bounds = array<i64: 1, 1, 32>}, {transform_indices = @transform_4, window_bounds = array<i64: 1, 16, 32>}]} {
    %c0 = arith.constant 0 : index
    %c0_0 = arith.constant 0 : index
    %c0_1 = arith.constant 0 : index
    %0 = vector.load %arg1[%c0, %c0_0, %c0_1] : memref<1x16x32xbf16, #tpu.memory_space<vmem>>, vector<1x16x32xbf16>
    %1 = arith.extf %0 : vector<1x16x32xbf16> to vector<1x16x32xf32>
    %c0_2 = arith.constant 0 : index
    %c0_3 = arith.constant 0 : index
    %c0_4 = arith.constant 0 : index
    %2 = vector.load %arg2[%c0_2, %c0_3, %c0_4] : memref<1x16x32xf32, #tpu.memory_space<vmem>>, vector<1x16x32xf32>
    %3 = arith.addf %1, %2 : vector<1x16x32xf32>
    %cst = arith.constant dense<0.000000e+00> : vector<1x16xf32>
    %4 = vector.multi_reduction <add>, %3, %cst [2] : vector<1x16x32xf32> to vector<1x16xf32>
    %5 = vector.shape_cast %4 : vector<1x16xf32> to vector<1x16x1xf32>
    %cst_5 = arith.constant 3.200000e+01 : f32
    %6 = vector.broadcast %cst_5 : f32 to vector<1x16x1xf32>
    %7 = arith.divf %5, %6 : vector<1x16x1xf32>
    %8 = vector.broadcast %7 : vector<1x16x1xf32> to vector<1x16x32xf32>
    %9 = arith.subf %3, %8 : vector<1x16x32xf32>
    %10 = arith.mulf %9, %9 : vector<1x16x32xf32>
    %cst_6 = arith.constant dense<0.000000e+00> : vector<1x16xf32>
    %11 = vector.multi_reduction <add>, %10, %cst_6 [2] : vector<1x16x32xf32> to vector<1x16xf32>
    %12 = vector.shape_cast %11 : vector<1x16xf32> to vector<1x16x1xf32>
    %cst_7 = arith.constant 3.200000e+01 : f32
    %13 = vector.broadcast %cst_7 : f32 to vector<1x16x1xf32>
    %14 = arith.divf %12, %13 : vector<1x16x1xf32>
    %15 = vector.broadcast %7 : vector<1x16x1xf32> to vector<1x16x32xf32>
    %16 = arith.subf %3, %15 : vector<1x16x32xf32>
    %cst_8 = arith.constant 9.99999974E-6 : f32
    %17 = vector.broadcast %cst_8 : f32 to vector<1x16x1xf32>
    %18 = arith.addf %14, %17 : vector<1x16x1xf32>
    %19 = math.rsqrt %18 : vector<1x16x1xf32>
    %20 = vector.broadcast %19 : vector<1x16x1xf32> to vector<1x16x32xf32>
    %21 = arith.mulf %16, %20 : vector<1x16x32xf32>
    %c0_9 = arith.constant 0 : index
    %c0_10 = arith.constant 0 : index
    %c0_11 = arith.constant 0 : index
    %22 = vector.load %arg3[%c0_9, %c0_10, %c0_11] : memref<1x1x32xf32, #tpu.memory_space<vmem>>, vector<1x1x32xf32>
    %23 = vector.broadcast %22 : vector<1x1x32xf32> to vector<1x16x32xf32>
    %24 = arith.mulf %21, %23 : vector<1x16x32xf32>
    %c0_12 = arith.constant 0 : index
    %c0_13 = arith.constant 0 : index
    %c0_14 = arith.constant 0 : index
    %25 = vector.load %arg4[%c0_12, %c0_13, %c0_14] : memref<1x1x32xf32, #tpu.memory_space<vmem>>, vector<1x1x32xf32>
    %26 = vector.broadcast %25 : vector<1x1x32xf32> to vector<1x16x32xf32>
    %27 = arith.addf %24, %26 : vector<1x16x32xf32>
    %28 = arith.truncf %27 : vector<1x16x32xf32> to vector<1x16x32xbf16>
    %c0_15 = arith.constant 0 : index
    %c0_16 = arith.constant 0 : index
    %c0_17 = arith.constant 0 : index
    %29 = vector.load %arg5[%c0_15, %c0_16, %c0_17] : memref<1x16x32xbf16, #tpu.memory_space<vmem>>, vector<1x16x32xbf16>
    tpu.vector_store %arg5[%c0_15, %c0_16, %c0_17], %28 {strides = array<i32>} : memref<1x16x32xbf16, #tpu.memory_space<vmem>>, vector<1x16x32xbf16>,
    return
  }
  func.func @transform_0(%arg0: i32) -> (i32, i32, i32) {
    %c0_i32 = arith.constant 0 : i32
    %c0_i32_0 = arith.constant 0 : i32
    %c0_i32_1 = arith.constant 0 : i32
    return %arg0, %c0_i32, %c0_i32_0 : i32, i32, i32
  }
  func.func @transform_1(%arg0: i32) -> (i32, i32, i32) {
    %c0_i32 = arith.constant 0 : i32
    %c0_i32_0 = arith.constant 0 : i32
    %c0_i32_1 = arith.constant 0 : i32
    %c0_i32_2 = arith.constant 0 : i32
    return %c0_i32, %c0_i32_0, %c0_i32_1 : i32, i32, i32
  }
  func.func @transform_2(%arg0: i32) -> (i32, i32, i32) {
    %c0_i32 = arith.constant 0 : i32
    %c0_i32_0 = arith.constant 0 : i32
    %c0_i32_1 = arith.constant 0 : i32
    %c0_i32_2 = arith.constant 0 : i32
    return %c0_i32, %c0_i32_0, %c0_i32_1 : i32, i32, i32
  }
  func.func @transform_3(%arg0: i32) -> (i32, i32, i32) {
    %c0_i32 = arith.constant 0 : i32
    %c0_i32_0 = arith.constant 0 : i32
    %c0_i32_1 = arith.constant 0 : i32
    %c0_i32_2 = arith.constant 0 : i32
    return %c0_i32, %c0_i32_0, %c0_i32_1 : i32, i32, i32
  }
  func.func @transform_4(%arg0: i32) -> (i32, i32, i32) {
    %c0_i32 = arith.constant 0 : i32
    %c0_i32_0 = arith.constant 0 : i32
    %c0_i32_1 = arith.constant 0 : i32
    return %arg0, %c0_i32, %c0_i32_0 : i32, i32, i32
  }
}

module attributes {stable_mosaic.version = 11 : i64} {
  func.func @kernel(%arg0: i32, %arg1: memref<1x16x96xbf16, #tpu.memory_space<vmem>>, %arg2: memref<1x16x32xbf16, #tpu.memory_space<vmem>>) attributes {dimension_semantics = [#tpu.dimension_semantics<parallel>], iteration_bounds = array<i64: 2>, scalar_prefetch = 0 : i64, scratch_operands = 0 : i64, tpu.core_type = #tpu.core_type<tc>, window_params = [{transform_indices = @transform_0, window_bounds = array<i64: 1, 16, 96>}, {transform_indices = @transform_1, window_bounds = array<i64: 1, 16, 32>}]} {
    %c0 = arith.constant 0 : index
    %c0_0 = arith.constant 0 : index
    %c0_1 = arith.constant 0 : index
    %0 = vector.load %arg1[%c0, %c0_0, %c0_1] : memref<1x16x96xbf16, #tpu.memory_space<vmem>>, vector<1x16x96xbf16>
    %1 = vector.shape_cast %0 : vector<1x16x96xbf16> to vector<16x96xbf16>
    %2 = tpu.iota {dimensions = array<i32: 1>} : vector<16x16xi32>
    %c5_i32 = arith.constant 5 : i32
    %3 = vector.broadcast %c5_i32 : i32 to vector<16x16xi32>
    %4 = arith.cmpi slt, %2, %3 : vector<16x16xi32>
    %5 = vector.extract_strided_slice %1 {offsets = [0, 0], sizes = [16, 8], strides = [1, 1]} : vector<16x96xbf16> to vector<16x8xbf16>
    %6 = vector.extract_strided_slice %1 {offsets = [0, 32], sizes = [16, 8], strides = [1, 1]} : vector<16x96xbf16> to vector<16x8xbf16>
    %7 = vector.extract_strided_slice %1 {offsets = [0, 64], sizes = [16, 8], strides = [1, 1]} : vector<16x96xbf16> to vector<16x8xbf16>
    %cst = arith.constant dense<0.000000e+00> : vector<16x16xf32>
    %8 = tpu.matmul %5, %6, %cst {dimension_numbers = #tpu.dot_dimension_numbers<[1], [1], [0], [0], [0, 0, 1, 0], [], []>} : vector<16x8xbf16>, vector<16x8xbf16>, vector<16x16xf32> -> vector<16x16xf32>
    %cst_2 = arith.constant -1.000000e+30 : f32
    %9 = vector.broadcast %cst_2 : f32 to vector<16x16xf32>
    %10 = arith.select %4, %8, %9 : vector<16x16xi1>, vector<16x16xf32>
    %cst_3 = arith.constant dense<0xFF800000> : vector<16xf32>
    %11 = vector.multi_reduction <maximumf>, %10, %cst_3 [1] : vector<16x16xf32> to vector<16xf32>
    %12 = vector.shape_cast %11 : vector<16xf32> to vector<16x1xf32>
    %13 = vector.broadcast %12 : vector<16x1xf32> to vector<16x16xf32>
    %14 = arith.subf %10, %13 : vector<16x16xf32>
    %15 = math.exp %14 : vector<16x16xf32>
    %cst_4 = arith.constant dense<0.000000e+00> : vector<16xf32>
    %16 = vector.multi_reduction <add>, %15, %cst_4 [1] : vector<16x16xf32> to vector<16xf32>
    %17 = vector.shape_cast %16 : vector<16xf32> to vector<16x1xf32>
    %18 = tpu.reciprocal %17 {approx = true} : vector<16x1xf32> -> vector<16x1xf32>
    %19 = vector.broadcast %18 : vector<16x1xf32> to vector<16x16xf32>
    %20 = arith.mulf %15, %19 : vector<16x16xf32>
    %21 = arith.truncf %20 : vector<16x16xf32> to vector<16x16xbf16>
    %cst_5 = arith.constant dense<0.000000e+00> : vector<16x8xf32>
    %22 = tpu.matmul %21, %7, %cst_5 {dimension_numbers = #tpu.dot_dimension_numbers<[1], [0], [0], [1], [0, 0, 1, 1], [], []>} : vector<16x16xbf16>, vector<16x8xbf16>, vector<16x8xf32> -> vector<16x8xf32>
    %23 = vector.extract_strided_slice %1 {offsets = [0, 8], sizes = [16, 8], strides = [1, 1]} : vector<16x96xbf16> to vector<16x8xbf16>
    %24 = vector.extract_strided_slice %1 {offsets = [0, 40], sizes = [16, 8], strides = [1, 1]} : vector<16x96xbf16> to vector<16x8xbf16>
    %25 = vector.extract_strided_slice %1 {offsets = [0, 72], sizes = [16, 8], strides = [1, 1]} : vector<16x96xbf16> to vector<16x8xbf16>
    %cst_6 = arith.constant dense<0.000000e+00> : vector<16x16xf32>
    %26 = tpu.matmul %23, %24, %cst_6 {dimension_numbers = #tpu.dot_dimension_numbers<[1], [1], [0], [0], [0, 0, 1, 0], [], []>} : vector<16x8xbf16>, vector<16x8xbf16>, vector<16x16xf32> -> vector<16x16xf32>
    %cst_7 = arith.constant -1.000000e+30 : f32
    %27 = vector.broadcast %cst_7 : f32 to vector<16x16xf32>
    %28 = arith.select %4, %26, %27 : vector<16x16xi1>, vector<16x16xf32>
    %cst_8 = arith.constant dense<0xFF800000> : vector<16xf32>
    %29 = vector.multi_reduction <maximumf>, %28, %cst_8 [1] : vector<16x16xf32> to vector<16xf32>
    %30 = vector.shape_cast %29 : vector<16xf32> to vector<16x1xf32>
    %31 = vector.broadcast %30 : vector<16x1xf32> to vector<16x16xf32>
    %32 = arith.subf %28, %31 : vector<16x16xf32>
    %33 = math.exp %32 : vector<16x16xf32>
    %cst_9 = arith.constant dense<0.000000e+00> : vector<16xf32>
    %34 = vector.multi_reduction <add>, %33, %cst_9 [1] : vector<16x16xf32> to vector<16xf32>
    %35 = vector.shape_cast %34 : vector<16xf32> to vector<16x1xf32>
    %36 = tpu.reciprocal %35 {approx = true} : vector<16x1xf32> -> vector<16x1xf32>
    %37 = vector.broadcast %36 : vector<16x1xf32> to vector<16x16xf32>
    %38 = arith.mulf %33, %37 : vector<16x16xf32>
    %39 = arith.truncf %38 : vector<16x16xf32> to vector<16x16xbf16>
    %cst_10 = arith.constant dense<0.000000e+00> : vector<16x8xf32>
    %40 = tpu.matmul %39, %25, %cst_10 {dimension_numbers = #tpu.dot_dimension_numbers<[1], [0], [0], [1], [0, 0, 1, 1], [], []>} : vector<16x16xbf16>, vector<16x8xbf16>, vector<16x8xf32> -> vector<16x8xf32>
    %41 = vector.extract_strided_slice %1 {offsets = [0, 16], sizes = [16, 8], strides = [1, 1]} : vector<16x96xbf16> to vector<16x8xbf16>
    %42 = vector.extract_strided_slice %1 {offsets = [0, 48], sizes = [16, 8], strides = [1, 1]} : vector<16x96xbf16> to vector<16x8xbf16>
    %43 = vector.extract_strided_slice %1 {offsets = [0, 80], sizes = [16, 8], strides = [1, 1]} : vector<16x96xbf16> to vector<16x8xbf16>
    %cst_11 = arith.constant dense<0.000000e+00> : vector<16x16xf32>
    %44 = tpu.matmul %41, %42, %cst_11 {dimension_numbers = #tpu.dot_dimension_numbers<[1], [1], [0], [0], [0, 0, 1, 0], [], []>} : vector<16x8xbf16>, vector<16x8xbf16>, vector<16x16xf32> -> vector<16x16xf32>
    %cst_12 = arith.constant -1.000000e+30 : f32
    %45 = vector.broadcast %cst_12 : f32 to vector<16x16xf32>
    %46 = arith.select %4, %44, %45 : vector<16x16xi1>, vector<16x16xf32>
    %cst_13 = arith.constant dense<0xFF800000> : vector<16xf32>
    %47 = vector.multi_reduction <maximumf>, %46, %cst_13 [1] : vector<16x16xf32> to vector<16xf32>
    %48 = vector.shape_cast %47 : vector<16xf32> to vector<16x1xf32>
    %49 = vector.broadcast %48 : vector<16x1xf32> to vector<16x16xf32>
    %50 = arith.subf %46, %49 : vector<16x16xf32>
    %51 = math.exp %50 : vector<16x16xf32>
    %cst_14 = arith.constant dense<0.000000e+00> : vector<16xf32>
    %52 = vector.multi_reduction <add>, %51, %cst_14 [1] : vector<16x16xf32> to vector<16xf32>
    %53 = vector.shape_cast %52 : vector<16xf32> to vector<16x1xf32>
    %54 = tpu.reciprocal %53 {approx = true} : vector<16x1xf32> -> vector<16x1xf32>
    %55 = vector.broadcast %54 : vector<16x1xf32> to vector<16x16xf32>
    %56 = arith.mulf %51, %55 : vector<16x16xf32>
    %57 = arith.truncf %56 : vector<16x16xf32> to vector<16x16xbf16>
    %cst_15 = arith.constant dense<0.000000e+00> : vector<16x8xf32>
    %58 = tpu.matmul %57, %43, %cst_15 {dimension_numbers = #tpu.dot_dimension_numbers<[1], [0], [0], [1], [0, 0, 1, 1], [], []>} : vector<16x16xbf16>, vector<16x8xbf16>, vector<16x8xf32> -> vector<16x8xf32>
    %59 = vector.extract_strided_slice %1 {offsets = [0, 24], sizes = [16, 8], strides = [1, 1]} : vector<16x96xbf16> to vector<16x8xbf16>
    %60 = vector.extract_strided_slice %1 {offsets = [0, 56], sizes = [16, 8], strides = [1, 1]} : vector<16x96xbf16> to vector<16x8xbf16>
    %61 = vector.extract_strided_slice %1 {offsets = [0, 88], sizes = [16, 8], strides = [1, 1]} : vector<16x96xbf16> to vector<16x8xbf16>
    %cst_16 = arith.constant dense<0.000000e+00> : vector<16x16xf32>
    %62 = tpu.matmul %59, %60, %cst_16 {dimension_numbers = #tpu.dot_dimension_numbers<[1], [1], [0], [0], [0, 0, 1, 0], [], []>} : vector<16x8xbf16>, vector<16x8xbf16>, vector<16x16xf32> -> vector<16x16xf32>
    %cst_17 = arith.constant -1.000000e+30 : f32
    %63 = vector.broadcast %cst_17 : f32 to vector<16x16xf32>
    %64 = arith.select %4, %62, %63 : vector<16x16xi1>, vector<16x16xf32>
    %cst_18 = arith.constant dense<0xFF800000> : vector<16xf32>
    %65 = vector.multi_reduction <maximumf>, %64, %cst_18 [1] : vector<16x16xf32> to vector<16xf32>
    %66 = vector.shape_cast %65 : vector<16xf32> to vector<16x1xf32>
    %67 = vector.broadcast %66 : vector<16x1xf32> to vector<16x16xf32>
    %68 = arith.subf %64, %67 : vector<16x16xf32>
    %69 = math.exp %68 : vector<16x16xf32>
    %cst_19 = arith.constant dense<0.000000e+00> : vector<16xf32>
    %70 = vector.multi_reduction <add>, %69, %cst_19 [1] : vector<16x16xf32> to vector<16xf32>
    %71 = vector.shape_cast %70 : vector<16xf32> to vector<16x1xf32>
    %72 = tpu.reciprocal %71 {approx = true} : vector<16x1xf32> -> vector<16x1xf32>
    %73 = vector.broadcast %72 : vector<16x1xf32> to vector<16x16xf32>
    %74 = arith.mulf %69, %73 : vector<16x16xf32>
    %75 = arith.truncf %74 : vector<16x16xf32> to vector<16x16xbf16>
    %cst_20 = arith.constant dense<0.000000e+00> : vector<16x8xf32>
    %76 = tpu.matmul %75, %61, %cst_20 {dimension_numbers = #tpu.dot_dimension_numbers<[1], [0], [0], [1], [0, 0, 1, 1], [], []>} : vector<16x16xbf16>, vector<16x8xbf16>, vector<16x8xf32> -> vector<16x8xf32>
    %77 = tpu.concatenate %22, %40, %58, %76 in 1 : vector<16x8xf32>, vector<16x8xf32>, vector<16x8xf32>, vector<16x8xf32> -> vector<16x32xf32>
    %78 = arith.truncf %77 : vector<16x32xf32> to vector<16x32xbf16>
    %c0_21 = arith.constant 0 : index
    %c0_22 = arith.constant 0 : index
    %c0_23 = arith.constant 0 : index
    %79 = vector.load %arg2[%c0_21, %c0_22, %c0_23] : memref<1x16x32xbf16, #tpu.memory_space<vmem>>, vector<1x16x32xbf16>
    %80 = vector.shape_cast %79 : vector<1x16x32xbf16> to vector<16x32xbf16>
    %81 = vector.shape_cast %78 : vector<16x32xbf16> to vector<1x16x32xbf16>
    tpu.vector_store %arg2[%c0_21, %c0_22, %c0_23], %81 {strides = array<i32>} : memref<1x16x32xbf16, #tpu.memory_space<vmem>>, vector<1x16x32xbf16>,
    return
  }
  func.func @transform_0(%arg0: i32) -> (i32, i32, i32) {
    %c0_i32 = arith.constant 0 : i32
    %c0_i32_0 = arith.constant 0 : i32
    %c0_i32_1 = arith.constant 0 : i32
    return %arg0, %c0_i32, %c0_i32_0 : i32, i32, i32
  }
  func.func @transform_1(%arg0: i32) -> (i32, i32, i32) {
    %c0_i32 = arith.constant 0 : i32
    %c0_i32_0 = arith.constant 0 : i32
    %c0_i32_1 = arith.constant 0 : i32
    return %arg0, %c0_i32, %c0_i32_0 : i32, i32, i32
  }
}

module attributes {stable_mosaic.version = 11 : i64} {
  func.func @kernel(%arg0: i32, %arg1: i32, %arg2: i32, %arg3: memref<32x32xbf16, #tpu.memory_space<vmem>>, %arg4: memref<32x32xbf16, #tpu.memory_space<vmem>>, %arg5: memref<1x32xf32, #tpu.memory_space<vmem>>, %arg6: memref<32x32xbf16, #tpu.memory_space<vmem>>, %arg7: memref<32x32xbf16, #tpu.memory_space<vmem>>) attributes {dimension_semantics = [#tpu.dimension_semantics<parallel>, #tpu.dimension_semantics<parallel>, #tpu.dimension_semantics<arbitrary>], iteration_bounds = array<i64: 1, 1, 1>, scalar_prefetch = 0 : i64, scratch_operands = 0 : i64, tpu.core_type = #tpu.core_type<tc>, window_params = [{transform_indices = @transform_0, window_bounds = array<i64: 32, 32>}, {transform_indices = @transform_1, window_bounds = array<i64: 32, 32>}, {transform_indices = @transform_2, window_bounds = array<i64: 1, 32>}, {transform_indices = @transform_3, window_bounds = array<i64: 32, 32>}, {transform_indices = @transform_4, window_bounds = array<i64: 32, 32>}]} {
    %c0 = arith.constant 0 : index
    %c0_0 = arith.constant 0 : index
    %0 = vector.load %arg3[%c0, %c0_0] : memref<32x32xbf16, #tpu.memory_space<vmem>>, vector<32x32xbf16>
    %c0_1 = arith.constant 0 : index
    %c0_2 = arith.constant 0 : index
    %1 = vector.load %arg4[%c0_1, %c0_2] : memref<32x32xbf16, #tpu.memory_space<vmem>>, vector<32x32xbf16>
    %cst = arith.constant dense<0.000000e+00> : vector<32x32xf32>
    %2 = tpu.matmul %0, %1, %cst {dimension_numbers = #tpu.dot_dimension_numbers<[1], [0], [0], [1], [0, 0, 1, 1], [], []>} : vector<32x32xbf16>, vector<32x32xbf16>, vector<32x32xf32> -> vector<32x32xf32>
    %c0_3 = arith.constant 0 : index
    %c0_4 = arith.constant 0 : index
    %3 = vector.load %arg5[%c0_3, %c0_4] : memref<1x32xf32, #tpu.memory_space<vmem>>, vector<1x32xf32>
    %4 = vector.broadcast %3 : vector<1x32xf32> to vector<32x32xf32>
    %5 = arith.addf %2, %4 : vector<32x32xf32>
    %c0_5 = arith.constant 0 : index
    %c0_6 = arith.constant 0 : index
    %6 = vector.load %arg6[%c0_5, %c0_6] : memref<32x32xbf16, #tpu.memory_space<vmem>>, vector<32x32xbf16>
    %7 = arith.extf %6 : vector<32x32xbf16> to vector<32x32xf32>
    %8 = arith.addf %5, %7 : vector<32x32xf32>
    %9 = arith.truncf %8 : vector<32x32xf32> to vector<32x32xbf16>
    %c0_7 = arith.constant 0 : index
    %c0_8 = arith.constant 0 : index
    %10 = vector.load %arg7[%c0_7, %c0_8] : memref<32x32xbf16, #tpu.memory_space<vmem>>, vector<32x32xbf16>
    tpu.vector_store %arg7[%c0_7, %c0_8], %9 {strides = array<i32>} : memref<32x32xbf16, #tpu.memory_space<vmem>>, vector<32x32xbf16>,
    return
  }
  func.func @transform_0(%arg0: i32, %arg1: i32, %arg2: i32) -> (i32, i32) {
    %c0_i32 = arith.constant 0 : i32
    return %arg0, %arg2 : i32, i32
  }
  func.func @transform_1(%arg0: i32, %arg1: i32, %arg2: i32) -> (i32, i32) {
    %c0_i32 = arith.constant 0 : i32
    return %arg2, %arg1 : i32, i32
  }
  func.func @transform_2(%arg0: i32, %arg1: i32, %arg2: i32) -> (i32, i32) {
    %c0_i32 = arith.constant 0 : i32
    %c0_i32_0 = arith.constant 0 : i32
    return %c0_i32, %arg1 : i32, i32
  }
  func.func @transform_3(%arg0: i32, %arg1: i32, %arg2: i32) -> (i32, i32) {
    %c0_i32 = arith.constant 0 : i32
    return %arg0, %arg1 : i32, i32
  }
  func.func @transform_4(%arg0: i32, %arg1: i32, %arg2: i32) -> (i32, i32) {
    %c0_i32 = arith.constant 0 : i32
    return %arg0, %arg1 : i32, i32
  }
}

module attributes {stable_mosaic.version = 11 : i64} {
  func.func @kernel(%arg0: i32, %arg1: i32, %arg2: i32, %arg3: memref<32x32xbf16, #tpu.memory_space<vmem>>, %arg4: memref<32x64xbf16, #tpu.memory_space<vmem>>, %arg5: memref<1x32xf32, #tpu.memory_space<vmem>>, %arg6: memref<1x32xf32, #tpu.memory_space<vmem>>, %arg7: memref<1x64xf32, #tpu.memory_space<vmem>>, %arg8: memref<32x64xbf16, #tpu.memory_space<vmem>>) attributes {dimension_semantics = [#tpu.dimension_semantics<parallel>, #tpu.dimension_semantics<parallel>, #tpu.dimension_semantics<arbitrary>], iteration_bounds = array<i64: 1, 1, 1>, scalar_prefetch = 0 : i64, scratch_operands = 0 : i64, tpu.core_type = #tpu.core_type<tc>, window_params = [{transform_indices = @transform_0, window_bounds = array<i64: 32, 32>}, {transform_indices = @transform_1, window_bounds = array<i64: 32, 64>}, {pipeline_mode = #tpu.pipeline_mode<synchronous>, transform_indices = @transform_2, window_bounds = array<i64: 1, 32>}, {pipeline_mode = #tpu.pipeline_mode<synchronous>, transform_indices = @transform_3, window_bounds = array<i64: 1, 32>}, {transform_indices = @transform_4, window_bounds = array<i64: 1, 64>}, {transform_indices = @transform_5, window_bounds = array<i64: 32, 64>}]} {
    %c0 = arith.constant 0 : index
    %c0_0 = arith.constant 0 : index
    %0 = vector.load %arg3[%c0, %c0_0] : memref<32x32xbf16, #tpu.memory_space<vmem>>, vector<32x32xbf16>
    %1 = arith.extf %0 : vector<32x32xbf16> to vector<32x32xf32>
    %cst = arith.constant dense<0.000000e+00> : vector<32xf32>
    %2 = vector.multi_reduction <add>, %1, %cst [1] : vector<32x32xf32> to vector<32xf32>
    %3 = vector.shape_cast %2 : vector<32xf32> to vector<32x1xf32>
    %cst_1 = arith.constant 3.200000e+01 : f32
    %4 = vector.broadcast %cst_1 : f32 to vector<32x1xf32>
    %5 = arith.divf %3, %4 : vector<32x1xf32>
    %6 = vector.broadcast %5 : vector<32x1xf32> to vector<32x32xf32>
    %7 = arith.subf %1, %6 : vector<32x32xf32>
    %8 = arith.mulf %7, %7 : vector<32x32xf32>
    %cst_2 = arith.constant dense<0.000000e+00> : vector<32xf32>
    %9 = vector.multi_reduction <add>, %8, %cst_2 [1] : vector<32x32xf32> to vector<32xf32>
    %10 = vector.shape_cast %9 : vector<32xf32> to vector<32x1xf32>
    %cst_3 = arith.constant 3.200000e+01 : f32
    %11 = vector.broadcast %cst_3 : f32 to vector<32x1xf32>
    %12 = arith.divf %10, %11 : vector<32x1xf32>
    %13 = vector.broadcast %5 : vector<32x1xf32> to vector<32x32xf32>
    %14 = arith.subf %1, %13 : vector<32x32xf32>
    %cst_4 = arith.constant 9.99999974E-6 : f32
    %15 = vector.broadcast %cst_4 : f32 to vector<32x1xf32>
    %16 = arith.addf %12, %15 : vector<32x1xf32>
    %17 = math.rsqrt %16 : vector<32x1xf32>
    %18 = vector.broadcast %17 : vector<32x1xf32> to vector<32x32xf32>
    %19 = arith.mulf %14, %18 : vector<32x32xf32>
    %c0_5 = arith.constant 0 : index
    %c0_6 = arith.constant 0 : index
    %20 = vector.load %arg5[%c0_5, %c0_6] : memref<1x32xf32, #tpu.memory_space<vmem>>, vector<1x32xf32>
    %21 = vector.broadcast %20 : vector<1x32xf32> to vector<32x32xf32>
    %22 = arith.mulf %19, %21 : vector<32x32xf32>
    %c0_7 = arith.constant 0 : index
    %c0_8 = arith.constant 0 : index
    %23 = vector.load %arg6[%c0_7, %c0_8] : memref<1x32xf32, #tpu.memory_space<vmem>>, vector<1x32xf32>
    %24 = vector.broadcast %23 : vector<1x32xf32> to vector<32x32xf32>
    %25 = arith.addf %22, %24 : vector<32x32xf32>
    %26 = arith.truncf %25 : vector<32x32xf32> to vector<32x32xbf16>
    %c0_9 = arith.constant 0 : index
    %c0_10 = arith.constant 0 : index
    %27 = vector.load %arg4[%c0_9, %c0_10] : memref<32x64xbf16, #tpu.memory_space<vmem>>, vector<32x64xbf16>
    %cst_11 = arith.constant dense<0.000000e+00> : vector<32x64xf32>
    %28 = tpu.matmul %26, %27, %cst_11 {dimension_numbers = #tpu.dot_dimension_numbers<[1], [0], [0], [1], [0, 0, 1, 1], [], []>} : vector<32x32xbf16>, vector<32x64xbf16>, vector<32x64xf32> -> vector<32x64xf32>
    %c0_12 = arith.constant 0 : index
    %c0_13 = arith.constant 0 : index
    %29 = vector.load %arg7[%c0_12, %c0_13] : memref<1x64xf32, #tpu.memory_space<vmem>>, vector<1x64xf32>
    %30 = vector.broadcast %29 : vector<1x64xf32> to vector<32x64xf32>
    %31 = arith.addf %28, %30 : vector<32x64xf32>
    %cst_14 = arith.constant 1.702000e+00 : f32
    %32 = vector.broadcast %cst_14 : f32 to vector<32x64xf32>
    %33 = arith.mulf %32, %31 : vector<32x64xf32>
    %34 = arith.negf %33 : vector<32x64xf32>
    %35 = math.exp %34 : vector<32x64xf32>
    %cst_15 = arith.constant 1.000000e+00 : f32
    %36 = vector.broadcast %cst_15 : f32 to vector<32x64xf32>
    %37 = arith.addf %36, %35 : vector<32x64xf32>
    %38 = arith.divf %36, %37 : vector<32x64xf32>
    %39 = arith.mulf %31, %38 : vector<32x64xf32>
    %40 = arith.truncf %39 : vector<32x64xf32> to vector<32x64xbf16>
    %c0_16 = arith.constant 0 : index
    %c0_17 = arith.constant 0 : index
    %41 = vector.load %arg8[%c0_16, %c0_17] : memref<32x64xbf16, #tpu.memory_space<vmem>>, vector<32x64xbf16>
    tpu.vector_store %arg8[%c0_16, %c0_17], %40 {strides = array<i32>} : memref<32x64xbf16, #tpu.memory_space<vmem>>, vector<32x64xbf16>,
    return
  }
  func.func @transform_0(%arg0: i32, %arg1: i32, %arg2: i32) -> (i32, i32) {
    %c0_i32 = arith.constant 0 : i32
    return %arg0, %arg2 : i32, i32
  }
  func.func @transform_1(%arg0: i32, %arg1: i32, %arg2: i32) -> (i32, i32) {
    %c0_i32 = arith.constant 0 : i32
    return %arg2, %arg1 : i32, i32
  }
  func.func @transform_2(%arg0: i32, %arg1: i32, %arg2: i32) -> (i32, i32) {
    %c0_i32 = arith.constant 0 : i32
    %c0_i32_0 = arith.constant 0 : i32
    %c0_i32_1 = arith.constant 0 : i32
    return %c0_i32, %c0_i32_0 : i32, i32
  }
  func.func @transform_3(%arg0: i32, %arg1: i32, %arg2: i32) -> (i32, i32) {
    %c0_i32 = arith.constant 0 : i32
    %c0_i32_0 = arith.constant 0 : i32
    %c0_i32_1 = arith.constant 0 : i32
    return %c0_i32, %c0_i32_0 : i32, i32
  }
  func.func @transform_4(%arg0: i32, %arg1: i32, %arg2: i32) -> (i32, i32) {
    %c0_i32 = arith.constant 0 : i32
    %c0_i32_0 = arith.constant 0 : i32
    return %c0_i32, %arg1 : i32, i32
  }
  func.func @transform_5(%arg0: i32, %arg1: i32, %arg2: i32) -> (i32, i32) {
    %c0_i32 = arith.constant 0 : i32
    return %arg0, %arg1 : i32, i32
  }
}

module attributes {stable_mosaic.version = 11 : i64} {
  func.func @kernel(%arg0: i32, %arg1: i32, %arg2: i32, %arg3: memref<32x64xbf16, #tpu.memory_space<vmem>>, %arg4: memref<64x32xbf16, #tpu.memory_space<vmem>>, %arg5: memref<1x32xf32, #tpu.memory_space<vmem>>, %arg6: memref<32x32xbf16, #tpu.memory_space<vmem>>, %arg7: memref<32x32xbf16, #tpu.memory_space<vmem>>) attributes {dimension_semantics = [#tpu.dimension_semantics<parallel>, #tpu.dimension_semantics<parallel>, #tpu.dimension_semantics<arbitrary>], iteration_bounds = array<i64: 1, 1, 1>, scalar_prefetch = 0 : i64, scratch_operands = 0 : i64, tpu.core_type = #tpu.core_type<tc>, window_params = [{transform_indices = @transform_0, window_bounds = array<i64: 32, 64>}, {transform_indices = @transform_1, window_bounds = array<i64: 64, 32>}, {transform_indices = @transform_2, window_bounds = array<i64: 1, 32>}, {transform_indices = @transform_3, window_bounds = array<i64: 32, 32>}, {transform_indices = @transform_4, window_bounds = array<i64: 32, 32>}]} {
    %c0 = arith.constant 0 : index
    %c0_0 = arith.constant 0 : index
    %0 = vector.load %arg3[%c0, %c0_0] : memref<32x64xbf16, #tpu.memory_space<vmem>>, vector<32x64xbf16>
    %c0_1 = arith.constant 0 : index
    %c0_2 = arith.constant 0 : index
    %1 = vector.load %arg4[%c0_1, %c0_2] : memref<64x32xbf16, #tpu.memory_space<vmem>>, vector<64x32xbf16>
    %cst = arith.constant dense<0.000000e+00> : vector<32x32xf32>
    %2 = tpu.matmul %0, %1, %cst {dimension_numbers = #tpu.dot_dimension_numbers<[1], [0], [0], [1], [0, 0, 1, 1], [], []>} : vector<32x64xbf16>, vector<64x32xbf16>, vector<32x32xf32> -> vector<32x32xf32>
    %c0_3 = arith.constant 0 : index
    %c0_4 = arith.constant 0 : index
    %3 = vector.load %arg5[%c0_3, %c0_4] : memref<1x32xf32, #tpu.memory_space<vmem>>, vector<1x32xf32>
    %4 = vector.broadcast %3 : vector<1x32xf32> to vector<32x32xf32>
    %5 = arith.addf %2, %4 : vector<32x32xf32>
    %c0_5 = arith.constant 0 : index
    %c0_6 = arith.constant 0 : index
    %6 = vector.load %arg6[%c0_5, %c0_6] : memref<32x32xbf16, #tpu.memory_space<vmem>>, vector<32x32xbf16>
    %7 = arith.extf %6 : vector<32x32xbf16> to vector<32x32xf32>
    %8 = arith.addf %5, %7 : vector<32x32xf32>
    %9 = arith.truncf %8 : vector<32x32xf32> to vector<32x32xbf16>
    %c0_7 = arith.constant 0 : index
    %c0_8 = arith.constant 0 : index
    %10 = vector.load %arg7[%c0_7, %c0_8] : memref<32x32xbf16, #tpu.memory_space<vmem>>, vector<32x32xbf16>
    tpu.vector_store %arg7[%c0_7, %c0_8], %9 {strides = array<i32>} : memref<32x32xbf16, #tpu.memory_space<vmem>>, vector<32x32xbf16>,
    return
  }
  func.func @transform_0(%arg0: i32, %arg1: i32, %arg2: i32) -> (i32, i32) {
    %c0_i32 = arith.constant 0 : i32
    return %arg0, %arg2 : i32, i32
  }
  func.func @transform_1(%arg0: i32, %arg1: i32, %arg2: i32) -> (i32, i32) {
    %c0_i32 = arith.constant 0 : i32
    return %arg2, %arg1 : i32, i32
  }
  func.func @transform_2(%arg0: i32, %arg1: i32, %arg2: i32) -> (i32, i32) {
    %c0_i32 = arith.constant 0 : i32
    %c0_i32_0 = arith.constant 0 : i32
    return %c0_i32, %arg1 : i32, i32
  }
  func.func @transform_3(%arg0: i32, %arg1: i32, %arg2: i32) -> (i32, i32) {
    %c0_i32 = arith.constant 0 : i32
    return %arg0, %arg1 : i32, i32
  }
  func.func @transform_4(%arg0: i32, %arg1: i32, %arg2: i32) -> (i32, i32) {
    %c0_i32 = arith.constant 0 : i32
    return %arg0, %arg1 : i32, i32
  }
}

module attributes {stable_mosaic.version = 11 : i64} {
  func.func @kernel(%arg0: i32, %arg1: i32, %arg2: i32, %arg3: memref<2x32xbf16, #tpu.memory_space<vmem>>, %arg4: memref<32x128xbf16, #tpu.memory_space<vmem>>, %arg5: memref<1x128xf32, #tpu.memory_space<vmem>>, %arg6: memref<2x128xf32, #tpu.memory_space<vmem>>) attributes {dimension_semantics = [#tpu.dimension_semantics<parallel>, #tpu.dimension_semantics<parallel>, #tpu.dimension_semantics<arbitrary>], iteration_bounds = array<i64: 1, 1, 1>, scalar_prefetch = 0 : i64, scratch_operands = 0 : i64, tpu.core_type = #tpu.core_type<tc>, window_params = [{transform_indices = @transform_0, window_bounds = array<i64: 2, 32>}, {transform_indices = @transform_1, window_bounds = array<i64: 32, 128>}, {transform_indices = @transform_2, window_bounds = array<i64: 1, 128>}, {transform_indices = @transform_3, window_bounds = array<i64: 2, 128>}]} {
    %c0 = arith.constant 0 : index
    %c0_0 = arith.constant 0 : index
    %0 = vector.load %arg3[%c0, %c0_0] : memref<2x32xbf16, #tpu.memory_space<vmem>>, vector<2x32xbf16>
    %c0_1 = arith.constant 0 : index
    %c0_2 = arith.constant 0 : index
    %1 = vector.load %arg4[%c0_1, %c0_2] : memref<32x128xbf16, #tpu.memory_space<vmem>>, vector<32x128xbf16>
    %cst = arith.constant dense<0.000000e+00> : vector<2x128xf32>
    %2 = tpu.matmul %0, %1, %cst {dimension_numbers = #tpu.dot_dimension_numbers<[1], [0], [0], [1], [0, 0, 1, 1], [], []>} : vector<2x32xbf16>, vector<32x128xbf16>, vector<2x128xf32> -> vector<2x128xf32>
    %c0_3 = arith.constant 0 : index
    %c0_4 = arith.constant 0 : index
    %3 = vector.load %arg5[%c0_3, %c0_4] : memref<1x128xf32, #tpu.memory_space<vmem>>, vector<1x128xf32>
    %4 = vector.broadcast %3 : vector<1x128xf32> to vector<2x128xf32>
    %5 = arith.addf %2, %4 : vector<2x128xf32>
    %c0_5 = arith.constant 0 : index
    %c0_6 = arith.constant 0 : index
    %6 = vector.load %arg6[%c0_5, %c0_6] : memref<2x128xf32, #tpu.memory_space<vmem>>, vector<2x128xf32>
    tpu.vector_store %arg6[%c0_5, %c0_6], %5 {strides = array<i32>} : memref<2x128xf32, #tpu.memory_space<vmem>>, vector<2x128xf32>,
    return
  }
  func.func @transform_0(%arg0: i32, %arg1: i32, %arg2: i32) -> (i32, i32) {
    %c0_i32 = arith.constant 0 : i32
    return %arg0, %arg2 : i32, i32
  }
  func.func @transform_1(%arg0: i32, %arg1: i32, %arg2: i32) -> (i32, i32) {
    %c0_i32 = arith.constant 0 : i32
    return %arg2, %arg1 : i32, i32
  }
  func.func @transform_2(%arg0: i32, %arg1: i32, %arg2: i32) -> (i32, i32) {
    %c0_i32 = arith.constant 0 : i32
    %c0_i32_0 = arith.constant 0 : i32
    return %c0_i32, %arg1 : i32, i32
  }
  func.func @transform_3(%arg0: i32, %arg1: i32, %arg2: i32) -> (i32, i32) {
    %c0_i32 = arith.constant 0 : i32
    return %arg0, %arg1 : i32, i32
  }
}

</mosaic_0001>

<bundles_post_ra>
// kernel: clip_model_forward.14
= control target key start
LH: loop header
LB: loop body
LE: loop exit
PB: predicated region body
PF: predicated region fallthrough
CT: control target
= control target key end

     0   :  { %s386_s15 = smov 0   ;;  %s426_s0 = inlined_call_operand.vmem [shape: bf16[2,16,32], index: 0, kind: input, shape index: {}]   ;;  %s427_s1 = inlined_call_operand.vmem [shape: f32[1,16,32], index: 1, kind: input, shape index: {}]   ;;  %s428_s2 = inlined_call_operand.vmem [shape: f32[1,1,32], index: 2, kind: input, shape index: {}]   ;;  %s429_s3 = inlined_call_operand.vmem [shape: f32[1,1,32], index: 3, kind: input, shape index: {}]   ;;  %s430_s4 = inlined_call_operand.vmem [shape: bf16[2,16,32], index: 4, kind: output, shape index: {}]  }
   0x1 LB: > { %s318_s16 = sadd.s32 4294967295, %s359_s15   ;;  %p322_p0 = scmp.ge.s32.totalorder %s359_s15, 1  ;;  %s359_s15 = sphi %s386_s15, %s14_s15  }
   0x2   : > { %p162_p1 = scmp.lt.s32.totalorder %s359_s15, 3 }
   0x4   : > { %p163_p2 = pnand %p322_p0, %p162_p1 }
   0x5   : > { %p188_p3 = scmp.lt.s32.totalorder (!%p163_p2), %s318_s16, 1  ;;  %v202_v1 = vld [vmem:[%s427_s1] sm:$0xff] (!%p163_p2)  ;;  %v203_v2 = vld [vmem:[%s427_s1 + $0x8] sm:$0xff] (!%p163_p2)  ;;  %vm206_vm0 = vcmask (!%p163_p2), 261120   ;;  %vm260_vm1 = vcmask (!%p163_p2), 257024  }
   0x6   : > { %166 = sbr.rel (%p163_p2) target bundleno = 341 (0x155), region = 36  ;;  %v327_v26 = vld [vmem:[%s428_s2] ss:$0 sm:$0xff] (!%p163_p2) }
   0x7   : > { %v328_v28 = vld [vmem:[%s429_s3] ss:$0 sm:$0xff] (!%p163_p2) }
   0xd   : > { %s432_s16 = smov (!%p188_p3, %s318_s16), 1 }
   0xe   : > { %s333_s17 = sshll.u32 %s432_s16, 3 }
   0xf   : > { %s192_s20 = scalar_lea.vmem %s426_s0, %s333_s17  ;;  %s197_s5 = scalar_lea.vmem %s430_s4, %s333_s17 }
  0x10   : > { %v338_v0 = vld [vmem:[%s192_s20] sm:$0xff]  }
  0x11   : > { %v339_v3 = vunpack.c.l.bf16 %v338_v0  ;;  %v340_v4 = vunpack.c.h.bf16 %v338_v0 }
  0x13   : > { %v204_v5 = vadd.f32 %v339_v3, %v202_v1  ;;  %v205_v6 = vadd.f32 %v340_v4, %v203_v2 }
  0x15   : > { %v207_v7 = vsel %vm206_vm0, %v204_v5, 0.0  ;;  %v210_v8 = vsel %vm206_vm0, %v205_v6, 0.0 }
  0x16   : > { %208 = vadd.xlane.f32.xlu0 %v207_v7 }
  0x1a   : > { %211 = vadd.xlane.f32.xlu0 %v210_v8 }
  0xa3   : > { %v209_v9 = vpop.xlane.xlu0 %208 }
  0xa4   : > { %v214_v10 = vmul.f32 0.03125, %v209_v9 }
  0xa6   : > { %v216_v11 = vsub.f32 %v204_v5, %v214_v10 }
  0xa7   : > { %v212_v12 = vpop.xlane.xlu0 %211 }
  0xa8   : > { %v215_v13 = vmul.f32 0.03125, %v212_v12  ;;  %v218_v14 = vmul.f32 %v216_v11, %v216_v11 }
  0xaa   : > { %v217_v15 = vsub.f32 %v205_v6, %v215_v13  ;;  %v220_v16 = vsel %vm206_vm0, %v218_v14, 0.0 }
  0xab   : > { %221 = vadd.xlane.f32.xlu1 %v220_v16 }
  0xac   : > { %v219_v17 = vmul.f32 %v217_v15, %v217_v15 }
  0xae   : > { %v223_v18 = vsel %vm206_vm0, %v219_v17, 0.0 }
  0xaf   : > { %224 = vadd.xlane.f32.xlu1 %v223_v18 }
 0x138   : > { %v222_v19 = vpop.xlane.xlu1 %221 }
 0x139   : > { %v226_v20 = vmul.f32 0.03125, %v222_v19 }
 0x13b   : > { %v228_v21 = vadd.f32 1e-05, %v226_v20 }
 0x13c   : > { %v225_v22 = vpop.xlane.xlu1 %224 }
 0x13d   : > { %349 = vrsqrt.f32 %v228_v21  ;;  %v227_v23 = vmul.f32 0.03125, %v225_v22 }
 0x13f   : > { %v229_v24 = vadd.f32 1e-05, %v227_v23 }
 0x141   : > { %351 = vrsqrt.f32 %v229_v24 }
 0x147   : > { %v350_v25 = vpop.eup %349 }
 0x148   : > { %v232_v27 = vmul.f32 %v350_v25, %v216_v11 }
 0x14a   : > { %v241_v29 = vmul.f32 %v327_v26, %v232_v27 }
 0x14b   : > { %v352_v30 = vpop.eup %351 }
 0x14c   : > { %v250_v31 = vadd.f32 %v328_v28, %v241_v29  ;;  %v233_v32 = vmul.f32 %v352_v30, %v217_v15 }
 0x14e   : > { %v335_v33 = vpack.c.bf16 %v250_v31, %v250_v31  ;;  %v242_v34 = vmul.f32 %v327_v26, %v233_v32 }
 0x150   : > { %261 = vst.msk [vmem:[%s197_s5] sm:$0xf] %vm260_vm1, %v335_v33  ;;  %v251_v35 = vadd.f32 %v328_v28, %v242_v34 }
 0x152   : > { %v336_v36 = vpack.c.bf16 %v251_v35, %v251_v35 }
 0x154   : > { %262 = vst.msk [vmem:[%s197_s5 + $0x4] sm:$0xf] %vm260_vm1, %v336_v36 }
 0x155 PF: > { %s14_s15 = sadd.s32 1, %s359_s15  }
 0x156   : > { %p11_p4 = scmp.ge.s32.totalorder %s14_s15, 4  }
 0x158   :  { %13 = sbr.rel (!%p11_p4) target bundleno = 1 (0x1), region = 66 }

// kernel: clip_model_forward.15
= control target key start
LH: loop header
LB: loop body
LE: loop exit
PB: predicated region body
PF: predicated region fallthrough
CT: control target
= control target key end

     0   :  { %vm29_vm0 = vcmask 261120   ;;  %vm201_vm1 = vcmask 781312   ;;  %s329_s0 = inlined_call_operand.vmem [shape: bf16[32,32], index: 0, kind: input, shape index: {}]   ;;  %s330_s1 = inlined_call_operand.vmem [shape: bf16[32,96], index: 1, kind: input, shape index: {}]   ;;  %s331_s2 = inlined_call_operand.vmem [shape: f32[1,32], index: 2, kind: input, shape index: {}]   ;;  %s332_s3 = inlined_call_operand.vmem [shape: f32[1,32], index: 3, kind: input, shape index: {}]   ;;  %s333_s4 = inlined_call_operand.vmem [shape: f32[1,96], index: 4, kind: input, shape index: {}]   ;;  %s334_s5 = inlined_call_operand.vmem [shape: bf16[32,96], index: 5, kind: output, shape index: {}]  }
   0x1   :  { %v226_v0 = vld [vmem:[%s329_s0] sm:$0xff]   ;;  %v233_v1 = vld [vmem:[%s329_s0 + $0x8] sm:$0xff]  }
   0x2   :  { %v227_v2 = vunpack.c.l.bf16 %v226_v0  ;;  %v231_v3 = vunpack.c.l.bf16 %v233_v1  ;;  %v228_v4 = vunpack.c.h.bf16 %v226_v0  ;;  %v232_v5 = vunpack.c.h.bf16 %v233_v1  ;;  %v246_v30 = vld [vmem:[%s330_s1] sm:$0xff]   ;;  %v247_v31 = vld [vmem:[%s330_s1 + $0x8] sm:$0xff]  }
   0x3   :  { %238 = vmatprep.subr.bf16.mxu0 %v246_v30  ;;  %v210_v46 = vld [vmem:[%s331_s2] ss:$0 sm:$0xff] }
   0x4   :  { %v30_v6 = vsel %vm29_vm0, %v227_v2, 0.0  ;;  %v36_v7 = vsel %vm29_vm0, %v231_v3, 0.0  ;;  %v33_v8 = vsel %vm29_vm0, %v228_v4, 0.0  ;;  %v39_v9 = vsel %vm29_vm0, %v232_v5, 0.0  ;;  %239 = vmatpush3.bf16.msra.mxu0 %v246_v30  ;;  %v211_v52 = vld [vmem:[%s332_s3] ss:$0 sm:$0xff] }
   0x5   :  { %31 = vadd.xlane.f32.xlu0 %v30_v6  ;;  %37 = vadd.xlane.f32.xlu1 %v36_v7  ;;  %v212_v0 = vld [vmem:[%s333_s4] ss:$0 sm:$0xff] }
   0x6   :  { %240 = vmatprep.subr.bf16.mxu0 %v247_v31 }
   0x8   :  { %241 = vmatpush3.bf16.msra.mxu0 %v247_v31 }
   0x9   :  { %34 = vadd.xlane.f32.xlu0 %v33_v8  ;;  %40 = vadd.xlane.f32.xlu1 %v39_v9 }
  0x92   :  { %v32_v10 = vpop.xlane.xlu0 %31  ;;  %v38_v11 = vpop.xlane.xlu1 %37 }
  0x93   :  { %v43_v12 = vmul.f32 0.03125, %v32_v10  ;;  %v45_v13 = vmul.f32 0.03125, %v38_v11 }
  0x95   :  { %v47_v14 = vsub.f32 %v227_v2, %v43_v12  ;;  %v49_v15 = vsub.f32 %v231_v3, %v45_v13 }
  0x96   :  { %v35_v16 = vpop.xlane.xlu0 %34  ;;  %v41_v17 = vpop.xlane.xlu1 %40 }
  0x97   :  { %v44_v18 = vmul.f32 0.03125, %v35_v16  ;;  %v46_v19 = vmul.f32 0.03125, %v41_v17  ;;  %v51_v20 = vmul.f32 %v47_v14, %v47_v14  ;;  %v53_v21 = vmul.f32 %v49_v15, %v49_v15 }
  0x99   :  { %v48_v22 = vsub.f32 %v228_v4, %v44_v18  ;;  %v50_v23 = vsub.f32 %v232_v5, %v46_v19  ;;  %v55_v24 = vsel %vm29_vm0, %v51_v20, 0.0  ;;  %v61_v25 = vsel %vm29_vm0, %v53_v21, 0.0 }
  0x9a   :  { %56 = vadd.xlane.f32.xlu0 %v55_v24 }
  0x9b   :  { %v52_v26 = vmul.f32 %v48_v22, %v48_v22  ;;  %v54_v27 = vmul.f32 %v50_v23, %v50_v23 }
  0x9d   :  { %v58_v28 = vsel %vm29_vm0, %v52_v26, 0.0  ;;  %v64_v29 = vsel %vm29_vm0, %v54_v27, 0.0 }
  0x9e   :  { %62 = vadd.xlane.f32.xlu0 %v61_v25  ;;  %59 = vadd.xlane.f32.xlu1 %v58_v28 }
  0xa2   :  { %65 = vadd.xlane.f32.xlu1 %v64_v29 }
 0x127   :  { %v57_v32 = vpop.xlane.xlu0 %56 }
 0x128   :  { %v67_v33 = vmul.f32 0.03125, %v57_v32 }
 0x12a   :  { %v71_v34 = vadd.f32 1e-05, %v67_v33 }
 0x12b   :  { %v60_v35 = vpop.xlane.xlu1 %59  ;;  %v63_v36 = vpop.xlane.xlu0 %62 }
 0x12c   :  { %248 = vrsqrt.f32 %v71_v34  ;;  %v68_v37 = vmul.f32 0.03125, %v60_v35  ;;  %v69_v38 = vmul.f32 0.03125, %v63_v36 }
 0x12e   :  { %v72_v39 = vadd.f32 1e-05, %v68_v37  ;;  %v73_v40 = vadd.f32 1e-05, %v69_v38 }
 0x12f   :  { %v66_v41 = vpop.xlane.xlu1 %65 }
 0x130   :  { %250 = vrsqrt.f32 %v72_v39  ;;  %v70_v42 = vmul.f32 0.03125, %v66_v41 }
 0x131   :  { %252 = vrsqrt.f32 %v73_v40 }
 0x132   :  { %v74_v43 = vadd.f32 1e-05, %v70_v42 }
 0x134   :  { %254 = vrsqrt.f32 %v74_v43 }
 0x136   :  { %v249_v44 = vpop.eup %248 }
 0x137   :  { %v79_v45 = vmul.f32 %v249_v44, %v47_v14 }
 0x139   :  { %v90_v50 = vmul.f32 %v210_v46, %v79_v45 }
 0x13a   :  { %v251_v47 = vpop.eup %250 }
 0x13b   :  { %v253_v48 = vpop.eup %252  ;;  %v80_v49 = vmul.f32 %v251_v47, %v48_v22  ;;  %v101_v56 = vadd.f32 %v211_v52, %v90_v50 }
 0x13c   :  { %v81_v51 = vmul.f32 %v253_v48, %v49_v15 }
 0x13d   :  { %v91_v53 = vmul.f32 %v210_v46, %v80_v49 }
 0x13e   :  { %v255_v54 = vpop.eup %254  ;;  %v92_v58 = vmul.f32 %v210_v46, %v81_v51 }
 0x13f   :  { %v82_v55 = vmul.f32 %v255_v54, %v50_v23  ;;  %v102_v57 = vadd.f32 %v211_v52, %v91_v53 }
 0x140   :  { %v103_v61 = vadd.f32 %v211_v52, %v92_v58 }
 0x141   :  { %v105_v59 = vpack.c.bf16 %v102_v57, %v101_v56  ;;  %v93_v60 = vmul.f32 %v210_v46, %v82_v55 }
 0x143   :  { %242 = vmatprep.mubr.msk.bf16.mxu0 %vm29_vm0, %v105_v59  ;;  %v104_v62 = vadd.f32 %v211_v52, %v93_v60 }
 0x145   :  { %v106_v63 = vpack.c.bf16 %v104_v62, %v103_v61 }
 0x147   :  { %243 = vmatmul.mubr.msk.bf16.vlgmr.msra.gmra.mrb[0].mxu0 %vm29_vm0, %v106_v63 }
 0x21a   :  { %v244_v1 = vpop.f32.mrb[0].mxu0 }
 0x21b   :  { %v179_v2 = vadd.f32 %v244_v1, %v212_v0  ;;  %v170_v3 = vpop.f32.mrb[1].mxu0 }
 0x21c   :  { %v171_v4 = vadd.f32 %v212_v0, %v170_v3  ;;  %v245_v5 = vpop.f32.mrb[2].mxu0 }
 0x21d   :  { %v223_v6 = vpack.c.bf16 %v179_v2, %v179_v2  ;;  %v182_v7 = vadd.f32 %v245_v5, %v212_v0  ;;  %v173_v8 = vpop.f32.mrb[3].mxu0 }
 0x21e   :  { %v221_v9 = vpack.c.bf16 %v171_v4, %v171_v4  ;;  %v174_v10 = vadd.f32 %v212_v0, %v173_v8 }
 0x21f   :  { %204 = vst.msk [vmem:[%s334_s5 + $0x8] sm:$0xf] %vm201_vm1, %v223_v6  ;;  %v224_v11 = vpack.c.bf16 %v182_v7, %v182_v7 }
 0x220   :  { %202 = vst.msk [vmem:[%s334_s5] sm:$0xf] %vm201_vm1, %v221_v9  ;;  %v222_v12 = vpack.c.bf16 %v174_v10, %v174_v10 }
 0x221   :  { %205 = vst.msk [vmem:[%s334_s5 + $0xc] sm:$0xf] %vm201_vm1, %v224_v11 }
 0x222   :  { %203 = vst.msk [vmem:[%s334_s5 + $0x4] sm:$0xf] %vm201_vm1, %v222_v12 }

// kernel: clip_model_forward.13
= control target key start
LH: loop header
LB: loop body
LE: loop exit
PB: predicated region body
PF: predicated region fallthrough
CT: control target
= control target key end

     0   :  { %vm189_vm0 = vcmask 257024   ;;  %s322_s1 = inlined_call_operand.vmem [shape: bf16[256,32], index: 1, kind: input, shape index: {}]   ;;  %s323_s0 = inlined_call_operand.vmem [shape: bf16[8,256], index: 0, kind: input, shape index: {}]   ;;  %s324_s2 = inlined_call_operand.vmem [shape: bf16[8,32], index: 2, kind: output, shape index: {}]  }
   0x1   :  { %v235_v0 = vld [vmem:[%s322_s1 + $0x40] sm:$0xff]   ;;  %v237_v2 = vld [vmem:[%s322_s1 + $0x48] sm:$0xff]   ;;  %v239_v4 = vld [vmem:[%s322_s1 + $0x50] sm:$0xff]  }
   0x2   :  { %v236_v1 = vld [vmem:[%s322_s1] sm:$0xff]   ;;  %213 = vmatprep.subr.bf16.mxu0 %v235_v0  ;;  %v238_v3 = vld [vmem:[%s322_s1 + $0x8] sm:$0xff]   ;;  %v240_v5 = vld [vmem:[%s322_s1 + $0x10] sm:$0xff]  }
   0x3   :  { %214 = vmatpush3.bf16.msra.mxu0 %v236_v1  ;;  %v241_v6 = vld [vmem:[%s322_s1 + $0x58] sm:$0xff]   ;;  %v243_v8 = vld [vmem:[%s322_s1 + $0x60] sm:$0xff]   ;;  %v245_v10 = vld [vmem:[%s322_s1 + $0x68] sm:$0xff]  }
   0x4   :  { %215 = vmatprep.subr.bf16.mxu0 %v237_v2  ;;  %v242_v7 = vld [vmem:[%s322_s1 + $0x18] sm:$0xff]   ;;  %v244_v9 = vld [vmem:[%s322_s1 + $0x20] sm:$0xff]   ;;  %v246_v13 = vld [vmem:[%s322_s1 + $0x28] sm:$0xff]  }
   0x5   :  { %v12_v11 = vld [vmem:[%s323_s0] sm:$0xff]  ;;  %v247_v14 = vld [vmem:[%s322_s1 + $0x70] sm:$0xff]   ;;  %v249_v16 = vld [vmem:[%s322_s1 + $0x78] sm:$0xff]  }
   0x6   :  { %v196_v12 = vcombine.high %v12_v11, %v12_v11  ;;  %v248_v15 = vld [vmem:[%s322_s1 + $0x30] sm:$0xff]   ;;  %v250_v17 = vld [vmem:[%s322_s1 + $0x38] sm:$0xff]   ;;  %v195_v18 = vcombine.low %v12_v11, %v12_v11 }
   0x7   :  { %216 = vmatpush3.bf16.msra.mxu0 %v238_v3 }
   0x8   :  { %217 = vmatprep.subr.bf16.mxu0 %v239_v4  ;;  %180 = vmatprep.mubr.bf16.mxu0 %v196_v12 }
   0xb   :  { %218 = vmatpush3.bf16.msra.mxu0 %v240_v5 }
   0xc   :  { %219 = vmatprep.subr.bf16.mxu0 %v241_v6 }
   0xf   :  { %220 = vmatpush3.bf16.msra.mxu0 %v242_v7 }
  0x10   :  { %221 = vmatprep.subr.bf16.mxu0 %v243_v8 }
  0x13   :  { %222 = vmatpush3.bf16.msra.mxu0 %v244_v9 }
  0x14   :  { %223 = vmatprep.subr.bf16.mxu0 %v245_v10 }
  0x17   :  { %224 = vmatpush3.bf16.msra.mxu0 %v246_v13 }
  0x18   :  { %225 = vmatprep.subr.bf16.mxu0 %v247_v14 }
  0x1b   :  { %226 = vmatpush3.bf16.msra.mxu0 %v248_v15 }
  0x1c   :  { %227 = vmatprep.subr.bf16.mxu0 %v249_v16 }
  0x1f   :  { %228 = vmatpush3.bf16.msra.mxu0 %v250_v17 }
  0x22   :  { %181 = vmatmul.mubr.bf16.vlgmr.msra.gmra.mrb[0].mxu0 %v195_v18 }
  0xf5   :  { %v229_v19 = vpop.f32.mrb[0].mxu0 }
  0xf6   :  { %v230_v20 = vpop.f32.mrb[1].mxu0 }
  0xf7   :  { %v231_v21 = vadd.f32 %v230_v20, %v229_v19  ;;  %v232_v22 = vpop.f32.mrb[2].mxu0 }
  0xf8   :  { %v233_v23 = vpop.f32.mrb[3].mxu0 }
  0xf9   :  { %v188_v24 = vpack.c.bf16 %v231_v21, %v231_v21 }
  0xfb   :  { %190 = vst.msk [vmem:[%s324_s2] sm:$0xf] %vm189_vm0, %v188_v24 }

// kernel: clip_model_forward.16
= control target key start
LH: loop header
LB: loop body
LE: loop exit
PB: predicated region body
PF: predicated region fallthrough
CT: control target
= control target key end

     0   :  { %s913_s6 = smov 0   ;;  %s1032_s0 = inlined_call_operand.vmem [shape: bf16[2,16,96], index: 0, kind: input, shape index: {}]   ;;  %s1033_s1 = inlined_call_operand.vmem [shape: bf16[2,16,32], index: 1, kind: output, shape index: {}]  }
   0x1 LB: > { %s717_s7 = sadd.s32 4294967295, %s885_s6   ;;  %p721_p0 = scmp.ge.s32.totalorder %s885_s6, 1  ;;  %s885_s6 = sphi %s913_s6, %s11_s6  }
   0x2   : > { %p87_p1 = scmp.lt.s32.totalorder %s885_s6, 3 }
   0x4   : > { %p88_p2 = pnand %p721_p0, %p87_p1 }
   0x5   : > { %p107_p3 = scmp.lt.s32.totalorder (!%p88_p2), %s717_s7, 1  ;;  %v887_v0 = vmov (!%p88_p2), 0.0   ;;  %vm888_vm0 = vmmov (!%p88_p2), 0   ;;  %s889_s12 = smov (!%p88_p2), 96   ;;  %vm130_vm1 = vcmask (!%p88_p2), 64512   ;;  %v120_v4 = vlaneseq (!%p88_p2) }
   0x6   : > { %91 = sbr.rel (%p88_p2) target bundleno = 1565 (0x61d), region = 24  ;;  %759 = vmatprep.subr.bf16.mxu0 (!%p88_p2), %v887_v0  ;;  %761 = vmatprep.mubr.msk.bf16.mxu0 (!%p88_p2), %vm888_vm0, %v887_v0  ;;  %vm180_vm3 = vcmask (!%p88_p2), 130048   ;;  %s890_s13 = smov (!%p88_p2), 64   ;;  %vm648_vm4 = vcmask (!%p88_p2), 195584   ;;  %vm659_vm5 = vcmask (!%p88_p2), 257024  }
   0x7   : > { %765 = vmatprep.subr.bf16.mxu1 (!%p88_p2), %v887_v0  ;;  %767 = vmatprep.mubr.msk.bf16.mxu1 (!%p88_p2), %vm888_vm0, %v887_v0  ;;  %v944_v5 = vand.u32 (!%p88_p2), 127, %v120_v4  ;;  %s891_s14 = smov (!%p88_p2), 80   ;;  %s892_s15 = smov (!%p88_p2), 88  }
   0x8   : > { %s893_s16 = smov (!%p88_p2), 120   ;;  %s894_s17 = smov (!%p88_p2), 112  }
   0x9   : > { %vm122_vm2 = vcmp.lt.s32.totalorder (!%p88_p2), %v944_v5, 5  ;;  %s895_s18 = smov (!%p88_p2), 72   ;;  %s896_s19 = smov (!%p88_p2), 104  }
   0xa   : > { %s897_s20 = smov (!%p88_p2), 56   ;;  %s898_s21 = smov (!%p88_p2), 40  }
   0xb   : > { %s899_s22 = smov (!%p88_p2), 48   ;;  %s900_s23 = smov (!%p88_p2), 8  }
   0xc   : > { %s901_s24 = smov (!%p88_p2), 16   ;;  %s902_s25 = smov (!%p88_p2), 24  }
   0xd   : > { %s1035_s7 = smov (!%p107_p3, %s717_s7), 1 }
   0xe   : > { %s739_s8 = sshll.u32 %s1035_s7, 3 }
   0xf   : > { %s111_s11 = scalar_lea.vmem %s1032_s0, %s739_s8  ;;  %s116_s28 = scalar_lea.vmem %s1033_s1, %s739_s8 }
  0x10   : > { %v935_v1 = vld [vmem:[%s111_s11] sm:$0xff]  }
  0x11   : > { %128 = vrot.lane.b32.xlu0 %v935_v1, %s889_s12 }
  0x83   : > { %v129_v2 = vpop.permute.xlu0 %128 }
  0x84   : > { %v135_v3 = vsel %vm130_vm1, %v129_v2, 0 }
  0x85   : > { %760 = vmatpush3.bf16.xpose.msra.mxu0 %v135_v3 }
  0x86   : > { %777 = vmatprep.subr.bf16.mxu0 %v887_v0 }
  0x8c   : > { %762 = vmatmul.mubr.msk.bf16.vlgmr.msra.gmra.mrb[0].mxu0 %vm130_vm1, %v935_v1 }
  0x8d   : > { %779 = vmatprep.mubr.msk.bf16.mxu0 %vm888_vm0, %v887_v0 }
 0x15f   : > { %v171_v6 = vpop.f32.mrb[0].mxu0 }
 0x160   : > { %v178_v7 = vsel %vm122_vm2, %v171_v6, -1e+30  ;;  %v763_v8 = vpop.f32.mrb[1].mxu0 }
 0x161   : > { %v174_v9 = vpop.f32.mrb[2].mxu0  ;;  %v181_v10 = vsel %vm180_vm3, %v178_v7, -inf }
 0x162   : > { %v179_v11 = vsel %vm122_vm2, %v174_v9, -1e+30  ;;  %182 = vmax.xlane.f32.xlu0 %v181_v10  ;;  %v764_v12 = vpop.f32.mrb[3].mxu0 }
 0x163   : > { %v184_v13 = vsel %vm180_vm3, %v179_v11, -inf }
 0x164   : > { %185 = vmax.xlane.f32.xlu1 %v184_v13 }
 0x175   : > { %204 = vrot.lane.b32.xlu1 %v935_v1, %s890_s13 }
 0x178   : > { %376 = vrot.lane.b32.xlu0 %v935_v1, %s891_s14 }
 0x1ef   : > { %v183_v14 = vpop.xlane.xlu0 %182 }
 0x1f0   : > { %v187_v15 = vsub.f32 %v178_v7, %v183_v14 }
 0x1f1   : > { %v186_v16 = vpop.xlane.xlu1 %185 }
 0x1f2   : > { %v189_v17 = vmul.f32 1.442695, %v187_v15  ;;  %v188_v18 = vsub.f32 %v179_v11, %v186_v16 }
 0x1f3   : > { %v377_v35 = vpop.permute.xlu0 %376 }
 0x1f4   : > { %847 = vpow2.f32 %v189_v17  ;;  %v191_v19 = vmul.f32 1.442695, %v188_v18  ;;  %v382_v37 = vsel %vm130_vm1, %v377_v35, 0 }
 0x1f5   : > { %v205_v20 = vpop.permute.xlu1 %204 }
 0x1f6   : > { %849 = vpow2.f32 %v191_v19  ;;  %766 = vmatpush3.bf16.msra.mxu1 %v205_v20 }
 0x1f7   : > { %771 = vmatprep.subr.bf16.mxu1 %v887_v0 }
 0x1fe   : > { %v848_v21 = vpop.eup %847 }
 0x1ff   : > { %v193_v22 = vsel %vm180_vm3, %v848_v21, 0.0 }
 0x200   : > { %v850_v23 = vpop.eup %849  ;;  %194 = vadd.xlane.f32.xlu1 %v193_v22 }
 0x201   : > { %v196_v24 = vsel %vm180_vm3, %v850_v23, 0.0 }
 0x204   : > { %197 = vadd.xlane.f32.xlu1 %v196_v24 }
 0x215   : > { %253 = vrot.lane.b32.xlu1 %v935_v1, %s892_s15 }
 0x219   : > { %251 = vrot.lane.b32.xlu1 %v935_v1, %s893_s16 }
 0x21d   : > { %374 = vrot.lane.b32.xlu1 %v935_v1, %s894_s17 }
 0x221   : > { %499 = vrot.lane.b32.xlu1 %v935_v1, %s895_s18 }
 0x225   : > { %497 = vrot.lane.b32.xlu1 %v935_v1, %s896_s19 }
 0x28d   : > { %v195_v25 = vpop.xlane.xlu1 %194 }
 0x28e   : > { %851 = vrcp.f32 %v195_v25 }
 0x291   : > { %v198_v26 = vpop.xlane.xlu1 %197 }
 0x292   : > { %853 = vrcp.f32 %v198_v26 }
 0x295   : > { %v254_v29 = vpop.permute.xlu1 %253 }
 0x296   : > { %v259_v32 = vsel %vm130_vm1, %v254_v29, 0 }
 0x298   : > { %v852_v27 = vpop.eup %851 }
 0x299   : > { %v201_v30 = vmul.f32 %v852_v27, %v848_v21  ;;  %v252_v34 = vpop.permute.xlu1 %251 }
 0x29c   : > { %v854_v28 = vpop.eup %853 }
 0x29d   : > { %v202_v31 = vmul.f32 %v854_v28, %v850_v23  ;;  %v375_v36 = vpop.permute.xlu1 %374 }
 0x29f   : > { %v203_v33 = vpack.c.bf16 %v202_v31, %v201_v30 }
 0x2a1   : > { %768 = vmatmul.mubr.msk.bf16.vlgmr.msra.gmra.mrb[0].mxu1 %vm180_vm3, %v203_v33  ;;  %v500_v38 = vpop.permute.xlu1 %499 }
 0x2a2   : > { %772 = vmatpush3.bf16.xpose.msra.mxu1 %v259_v32  ;;  %773 = vmatprep.mubr.msk.bf16.mxu1 %vm888_vm0, %v887_v0  ;;  %v505_v39 = vsel %vm130_vm1, %v500_v38, 0 }
 0x2a3   : > { %783 = vmatprep.subr.bf16.mxu1 %v887_v0 }
 0x2a5   : > { %v498_v40 = vpop.permute.xlu1 %497 }
 0x2a9   : > { %774 = vmatmul.mubr.msk.bf16.vlgmr.msra.gmra.mrb[4].mxu1 %vm130_vm1, %v252_v34 }
 0x2aa   : > { %784 = vmatpush3.bf16.xpose.msra.mxu1 %v382_v37  ;;  %785 = vmatprep.mubr.msk.bf16.mxu1 %vm888_vm0, %v887_v0 }
 0x2ab   : > { %795 = vmatprep.subr.bf16.mxu1 %v887_v0 }
 0x2b1   : > { %786 = vmatmul.mubr.msk.bf16.vlgmr.msra.gmra.mrb[8].mxu1 %vm130_vm1, %v375_v36 }
 0x2b2   : > { %796 = vmatpush3.bf16.xpose.msra.mxu1 %v505_v39  ;;  %797 = vmatprep.mubr.msk.bf16.mxu1 %vm888_vm0, %v887_v0 }
 0x2b9   : > { %798 = vmatmul.mubr.msk.bf16.vlgmr.msra.gmra.mrb[12].mxu1 %vm130_vm1, %v498_v40 }
 0x374   : > { %v978_v41 = vpop.f32.mrb[0].mxu1 }
 0x375   : > { %v769_v42 = vpop.f32.mrb[1].mxu1 }
 0x376   : > { %v980_v43 = vpop.f32.mrb[2].mxu1 }
 0x377   : > { %v770_v44 = vpop.f32.mrb[3].mxu1 }
 0x37c   : > { %v295_v45 = vpop.f32.mrb[4].mxu1 }
 0x37d   : > { %v302_v46 = vsel %vm122_vm2, %v295_v45, -1e+30  ;;  %v775_v47 = vpop.f32.mrb[5].mxu1 }
 0x37e   : > { %v298_v48 = vpop.f32.mrb[6].mxu1  ;;  %v304_v49 = vsel %vm180_vm3, %v302_v46, -inf }
 0x37f   : > { %v303_v50 = vsel %vm122_vm2, %v298_v48, -1e+30  ;;  %305 = vmax.xlane.f32.xlu1 %v304_v49  ;;  %v776_v51 = vpop.f32.mrb[7].mxu1 }
 0x380   : > { %v307_v52 = vsel %vm180_vm3, %v303_v50, -inf }
 0x381   : > { %308 = vmax.xlane.f32.xlu0 %v307_v52 }
 0x384   : > { %v418_v53 = vpop.f32.mrb[8].mxu1 }
 0x385   : > { %v425_v54 = vsel %vm122_vm2, %v418_v53, -1e+30  ;;  %v787_v55 = vpop.f32.mrb[9].mxu1 }
 0x386   : > { %v421_v56 = vpop.f32.mrb[10].mxu1  ;;  %v427_v57 = vsel %vm180_vm3, %v425_v54, -inf }
 0x387   : > { %v426_v58 = vsel %vm122_vm2, %v421_v56, -1e+30  ;;  %428 = vmax.xlane.f32.xlu1 %v427_v57  ;;  %v788_v59 = vpop.f32.mrb[11].mxu1 }
 0x388   : > { %v430_v60 = vsel %vm180_vm3, %v426_v58, -inf }
 0x389   : > { %431 = vmax.xlane.f32.xlu0 %v430_v60 }
 0x38c   : > { %v541_v61 = vpop.f32.mrb[12].mxu1 }
 0x38d   : > { %v548_v62 = vsel %vm122_vm2, %v541_v61, -1e+30  ;;  %v799_v63 = vpop.f32.mrb[13].mxu1 }
 0x38e   : > { %v544_v2 = vpop.f32.mrb[14].mxu1  ;;  %v550_v3 = vsel %vm180_vm3, %v548_v62, -inf }
 0x38f   : > { %v549_v4 = vsel %vm122_vm2, %v544_v2, -1e+30  ;;  %551 = vmax.xlane.f32.xlu1 %v550_v3  ;;  %v800_v6 = vpop.f32.mrb[15].mxu1 }
 0x390   : > { %v553_v7 = vsel %vm180_vm3, %v549_v4, -inf }
 0x391   : > { %554 = vmax.xlane.f32.xlu0 %v553_v7 }
 0x3a0   : > { %327 = vrot.lane.b32.xlu1 %v935_v1, %s897_s20 }
 0x40c   : > { %v306_v8 = vpop.xlane.xlu1 %305 }
 0x40d   : > { %v310_v9 = vsub.f32 %v302_v46, %v306_v8 }
 0x40e   : > { %v309_v10 = vpop.xlane.xlu0 %308 }
 0x40f   : > { %v312_v11 = vmul.f32 1.442695, %v310_v9  ;;  %v311_v12 = vsub.f32 %v303_v50, %v309_v10 }
 0x411   : > { %855 = vpow2.f32 %v312_v11  ;;  %v314_v13 = vmul.f32 1.442695, %v311_v12 }
 0x413   : > { %857 = vpow2.f32 %v314_v13 }
 0x414   : > { %v429_v14 = vpop.xlane.xlu1 %428 }
 0x415   : > { %v433_v15 = vsub.f32 %v425_v54, %v429_v14 }
 0x416   : > { %v432_v5 = vpop.xlane.xlu0 %431 }
 0x417   : > { %v435_v16 = vmul.f32 1.442695, %v433_v15  ;;  %v434_v17 = vsub.f32 %v426_v58, %v432_v5 }
 0x419   : > { %859 = vpow2.f32 %v435_v16  ;;  %v437_v18 = vmul.f32 1.442695, %v434_v17 }
 0x41b   : > { %v856_v19 = vpop.eup %855  ;;  %861 = vpow2.f32 %v437_v18 }
 0x41c   : > { %v552_v20 = vpop.xlane.xlu1 %551  ;;  %v316_v21 = vsel %vm180_vm3, %v856_v19, 0.0 }
 0x41d   : > { %v858_v22 = vpop.eup %857  ;;  %v556_v23 = vsub.f32 %v548_v62, %v552_v20  ;;  %317 = vadd.xlane.f32.xlu1 %v316_v21 }
 0x41e   : > { %v555_v24 = vpop.xlane.xlu0 %554  ;;  %v319_v25 = vsel %vm180_vm3, %v858_v22, 0.0 }
 0x41f   : > { %v558_v26 = vmul.f32 1.442695, %v556_v23  ;;  %v557_v27 = vsub.f32 %v549_v4, %v555_v24  ;;  %320 = vadd.xlane.f32.xlu0 %v319_v25 }
 0x420   : > { %v328_v28 = vpop.permute.xlu1 %327 }
 0x421   : > { %863 = vpow2.f32 %v558_v26  ;;  %v560_v29 = vmul.f32 1.442695, %v557_v27  ;;  %778 = vmatpush3.bf16.msra.mxu0 %v328_v28 }
 0x422   : > { %789 = vmatprep.subr.bf16.mxu0 %v887_v0 }
 0x423   : > { %v860_v30 = vpop.eup %859  ;;  %865 = vpow2.f32 %v560_v29 }
 0x424   : > { %v439_v31 = vsel %vm180_vm3, %v860_v30, 0.0 }
 0x425   : > { %v862_v32 = vpop.eup %861  ;;  %440 = vadd.xlane.f32.xlu1 %v439_v31 }
 0x426   : > { %v442_v33 = vsel %vm180_vm3, %v862_v32, 0.0 }
 0x427   : > { %443 = vadd.xlane.f32.xlu0 %v442_v33 }
 0x42b   : > { %v864_v34 = vpop.eup %863 }
 0x42c   : > { %v562_v35 = vsel %vm180_vm3, %v864_v34, 0.0 }
 0x42d   : > { %v866_v36 = vpop.eup %865  ;;  %563 = vadd.xlane.f32.xlu1 %v562_v35 }
 0x42e   : > { %v565_v37 = vsel %vm180_vm3, %v866_v36, 0.0 }
 0x42f   : > { %566 = vadd.xlane.f32.xlu0 %v565_v37 }
 0x43e   : > { %573 = vrot.lane.b32.xlu1 %v935_v1, %s898_s21 }
 0x445   : > { %450 = vrot.lane.b32.xlu0 %v935_v1, %s899_s22 }
 0x4aa   : > { %v318_v38 = vpop.xlane.xlu1 %317 }
 0x4ab   : > { %867 = vrcp.f32 %v318_v38 }
 0x4ac   : > { %v321_v39 = vpop.xlane.xlu0 %320 }
 0x4ad   : > { %869 = vrcp.f32 %v321_v39 }
 0x4b2   : > { %v441_v40 = vpop.xlane.xlu1 %440 }
 0x4b3   : > { %871 = vrcp.f32 %v441_v40 }
 0x4b4   : > { %v444_v42 = vpop.xlane.xlu0 %443 }
 0x4b5   : > { %v868_v44 = vpop.eup %867  ;;  %873 = vrcp.f32 %v444_v42 }
 0x4b6   : > { %v324_v46 = vmul.f32 %v868_v44, %v856_v19 }
 0x4b7   : > { %v870_v45 = vpop.eup %869 }
 0x4b8   : > { %v325_v47 = vmul.f32 %v870_v45, %v858_v22 }
 0x4ba   : > { %v564_v48 = vpop.xlane.xlu1 %563  ;;  %v326_v49 = vpack.c.bf16 %v325_v47, %v324_v46 }
 0x4bb   : > { %875 = vrcp.f32 %v564_v48 }
 0x4bc   : > { %v567_v50 = vpop.xlane.xlu0 %566  ;;  %780 = vmatmul.mubr.msk.bf16.vlgmr.msra.gmra.mrb[4].mxu0 %vm180_vm3, %v326_v49 }
 0x4bd   : > { %v872_v51 = vpop.eup %871  ;;  %877 = vrcp.f32 %v567_v50  ;;  %791 = vmatprep.mubr.msk.bf16.mxu0 %vm888_vm0, %v887_v0 }
 0x4be   : > { %v447_v52 = vmul.f32 %v872_v51, %v860_v30  ;;  %v574_v56 = vpop.permute.xlu1 %573 }
 0x4bf   : > { %v874_v1 = vpop.eup %873 }
 0x4c0   : > { %v448_v53 = vmul.f32 %v874_v1, %v862_v32  ;;  %v451_v54 = vpop.permute.xlu0 %450 }
 0x4c1   : > { %790 = vmatpush3.bf16.msra.mxu0 %v451_v54 }
 0x4c2   : > { %v449_v55 = vpack.c.bf16 %v448_v53, %v447_v52  ;;  %801 = vmatprep.subr.bf16.mxu0 %v887_v0 }
 0x4c4   : > { %792 = vmatmul.mubr.msk.bf16.vlgmr.msra.gmra.mrb[8].mxu0 %vm180_vm3, %v449_v55 }
 0x4c5   : > { %v876_v57 = vpop.eup %875  ;;  %802 = vmatpush3.bf16.msra.mxu0 %v574_v56  ;;  %803 = vmatprep.mubr.msk.bf16.mxu0 %vm888_vm0, %v887_v0 }
 0x4c6   : > { %v570_v59 = vmul.f32 %v876_v57, %v864_v34 }
 0x4c7   : > { %v878_v58 = vpop.eup %877 }
 0x4c8   : > { %v571_v60 = vmul.f32 %v878_v58, %v866_v36 }
 0x4ca   : > { %v572_v61 = vpack.c.bf16 %v571_v60, %v570_v59 }
 0x4cc   : > { %804 = vmatmul.mubr.msk.bf16.vlgmr.msra.gmra.mrb[12].mxu0 %vm180_vm3, %v572_v61 }
 0x58f   : > { %v367_v62 = vpop.f32.mrb[4].mxu0 }
 0x590   : > { %v781_v63 = vpop.f32.mrb[5].mxu0 }
 0x591   : > { %v370_v2 = vpop.f32.mrb[6].mxu0 }
 0x592   : > { %v831_v3 = vpack.i.bf16 %v370_v2, %v367_v62  ;;  %v782_v4 = vpop.f32.mrb[7].mxu0 }
 0x594   : > { %832 = vrot.lane.b32.xlu1 %v831_v3, %s900_s23 }
 0x597   : > { %v490_v6 = vpop.f32.mrb[8].mxu0 }
 0x598   : > { %v793_v7 = vpop.f32.mrb[9].mxu0 }
 0x599   : > { %v493_v8 = vpop.f32.mrb[10].mxu0 }
 0x59a   : > { %v836_v9 = vpack.i.bf16 %v493_v8, %v490_v6  ;;  %v794_v10 = vpop.f32.mrb[11].mxu0 }
 0x59c   : > { %837 = vrot.lane.b32.xlu0 %v836_v9, %s901_s24 }
 0x59f   : > { %v613_v0 = vpop.f32.mrb[12].mxu0 }
 0x5a0   : > { %v805_v11 = vpop.f32.mrb[13].mxu0 }
 0x5a1   : > { %v616_v12 = vpop.f32.mrb[14].mxu0 }
 0x5a2   : > { %v841_v13 = vpack.i.bf16 %v616_v12, %v613_v0  ;;  %v806_v14 = vpop.f32.mrb[15].mxu0 }
 0x5a4   : > { %842 = vrot.lane.b32.xlu1 %v841_v13, %s902_s25 }
 0x606   : > { %v833_v15 = vpop.permute.xlu1 %832 }
 0x607   : > { %v835_v16 = vunpack.i.h.bf16 %v833_v15  ;;  %v834_v17 = vunpack.i.l.bf16 %v833_v15 }
 0x609   : > { %v645_v21 = vsel %vm130_vm1, %v980_v43, %v835_v16  ;;  %v644_v22 = vsel %vm130_vm1, %v978_v41, %v834_v17 }
 0x60e   : > { %v838_v5 = vpop.permute.xlu0 %837 }
 0x60f   : > { %v840_v18 = vunpack.i.h.bf16 %v838_v5  ;;  %v839_v19 = vunpack.i.l.bf16 %v838_v5 }
 0x611   : > { %v647_v25 = vsel %vm180_vm3, %v645_v21, %v840_v18  ;;  %v646_v26 = vsel %vm180_vm3, %v644_v22, %v839_v19 }
 0x616   : > { %v843_v20 = vpop.permute.xlu1 %842 }
 0x617   : > { %v845_v23 = vunpack.i.h.bf16 %v843_v20  ;;  %v844_v24 = vunpack.i.l.bf16 %v843_v20 }
 0x619   : > { %v650_v27 = vsel %vm648_vm4, %v647_v25, %v845_v23  ;;  %v649_v28 = vsel %vm648_vm4, %v646_v26, %v844_v24 }
 0x61a   : > { %v742_v29 = vpack.c.bf16 %v650_v27, %v650_v27  ;;  %v741_v30 = vpack.c.bf16 %v649_v28, %v649_v28 }
 0x61c   : > { %661 = vst.msk [vmem:[%s116_s28 + $0x4] sm:$0xf] %vm659_vm5, %v742_v29  ;;  %660 = vst.msk [vmem:[%s116_s28] sm:$0xf] %vm659_vm5, %v741_v30 }
 0x61d PF: > { %s11_s6 = sadd.s32 1, %s885_s6  }
 0x61e   : > { %p8_p4 = scmp.ge.s32.totalorder %s11_s6, 4  }
 0x620   :  { %10 = sbr.rel (!%p8_p4) target bundleno = 1 (0x1), region = 54 }

// kernel: clip_model_forward.17
= control target key start
LH: loop header
LB: loop body
LE: loop exit
PB: predicated region body
PF: predicated region fallthrough
CT: control target
= control target key end

     0   :  { %vm55_vm0 = vcmask 261120   ;;  %vm139_vm1 = vcmask 257024   ;;  %s246_s1 = inlined_call_operand.vmem [shape: bf16[32,32], index: 1, kind: input, shape index: {}]   ;;  %s247_s0 = inlined_call_operand.vmem [shape: bf16[32,32], index: 0, kind: input, shape index: {}]   ;;  %s248_s3 = inlined_call_operand.vmem [shape: bf16[32,32], index: 3, kind: input, shape index: {}]   ;;  %s249_s2 = inlined_call_operand.vmem [shape: f32[1,32], index: 2, kind: input, shape index: {}]   ;;  %s250_s4 = inlined_call_operand.vmem [shape: bf16[32,32], index: 4, kind: output, shape index: {}]  }
   0x1   :  { %v184_v0 = vld [vmem:[%s246_s1] sm:$0xff]   ;;  %v185_v1 = vld [vmem:[%s246_s1 + $0x8] sm:$0xff]  }
   0x2   :  { %176 = vmatprep.subr.bf16.mxu0 %v184_v0  ;;  %v186_v2 = vld [vmem:[%s247_s0] sm:$0xff]   ;;  %v187_v3 = vld [vmem:[%s247_s0 + $0x8] sm:$0xff]  }
   0x3   :  { %177 = vmatpush3.bf16.msra.mxu0 %v184_v0  ;;  %180 = vmatprep.mubr.msk.bf16.mxu0 %vm55_vm0, %v186_v2  ;;  %v171_v4 = vld [vmem:[%s248_s3 + $0x8] sm:$0xff]   ;;  %v164_v5 = vld [vmem:[%s248_s3] sm:$0xff]  }
   0x4   :  { %178 = vmatprep.subr.bf16.mxu0 %v185_v1  ;;  %v148_v6 = vld [vmem:[%s249_s2] ss:$0 sm:$0xff]  ;;  %v169_v7 = vunpack.c.l.bf16 %v171_v4  ;;  %v165_v9 = vunpack.c.l.bf16 %v164_v5  ;;  %v170_v12 = vunpack.c.h.bf16 %v171_v4  ;;  %v166_v15 = vunpack.c.h.bf16 %v164_v5 }
   0x7   :  { %179 = vmatpush3.bf16.msra.mxu0 %v185_v1 }
   0xa   :  { %181 = vmatmul.mubr.msk.bf16.vlgmr.msra.gmra.mrb[0].mxu0 %vm55_vm0, %v187_v3 }
  0xdd   :  { %v182_v8 = vpop.f32.mrb[0].mxu0 }
  0xde   :  { %v105_v10 = vadd.f32 %v182_v8, %v148_v6  ;;  %v96_v11 = vpop.f32.mrb[1].mxu0 }
  0xdf   :  { %v97_v13 = vadd.f32 %v148_v6, %v96_v11  ;;  %v183_v14 = vpop.f32.mrb[2].mxu0 }
  0xe0   :  { %v121_v16 = vadd.f32 %v169_v7, %v105_v10  ;;  %v108_v17 = vadd.f32 %v183_v14, %v148_v6  ;;  %v99_v18 = vpop.f32.mrb[3].mxu0 }
  0xe1   :  { %v119_v19 = vadd.f32 %v165_v9, %v97_v13  ;;  %v100_v20 = vadd.f32 %v148_v6, %v99_v18 }
  0xe2   :  { %v161_v21 = vpack.c.bf16 %v121_v16, %v121_v16  ;;  %v122_v22 = vadd.f32 %v170_v12, %v108_v17 }
  0xe3   :  { %v159_v23 = vpack.c.bf16 %v119_v19, %v119_v19  ;;  %v120_v24 = vadd.f32 %v166_v15, %v100_v20 }
  0xe4   :  { %142 = vst.msk [vmem:[%s250_s4 + $0x8] sm:$0xf] %vm139_vm1, %v161_v21  ;;  %v162_v25 = vpack.c.bf16 %v122_v22, %v122_v22 }
  0xe5   :  { %140 = vst.msk [vmem:[%s250_s4] sm:$0xf] %vm139_vm1, %v159_v23  ;;  %v160_v26 = vpack.c.bf16 %v120_v24, %v120_v24 }
  0xe6   :  { %143 = vst.msk [vmem:[%s250_s4 + $0xc] sm:$0xf] %vm139_vm1, %v162_v25 }
  0xe7   :  { %141 = vst.msk [vmem:[%s250_s4 + $0x4] sm:$0xf] %vm139_vm1, %v160_v26 }

// kernel: clip_model_forward.18
= control target key start
LH: loop header
LB: loop body
LE: loop exit
PB: predicated region body
PF: predicated region fallthrough
CT: control target
= control target key end

     0   :  { %vm29_vm0 = vcmask 261120   ;;  %vm233_vm1 = vcmask 519168   ;;  %s381_s0 = inlined_call_operand.vmem [shape: bf16[32,32], index: 0, kind: input, shape index: {}]   ;;  %s382_s1 = inlined_call_operand.vmem [shape: bf16[32,64], index: 1, kind: input, shape index: {}]   ;;  %s383_s2 = inlined_call_operand.vmem [shape: f32[1,32], index: 2, kind: input, shape index: {}]   ;;  %s384_s3 = inlined_call_operand.vmem [shape: f32[1,32], index: 3, kind: input, shape index: {}]   ;;  %s385_s4 = inlined_call_operand.vmem [shape: f32[1,64], index: 4, kind: input, shape index: {}]   ;;  %s386_s5 = inlined_call_operand.vmem [shape: bf16[32,64], index: 5, kind: output, shape index: {}]  }
   0x1   :  { %v262_v0 = vld [vmem:[%s381_s0] sm:$0xff]   ;;  %v269_v1 = vld [vmem:[%s381_s0 + $0x8] sm:$0xff]  }
   0x2   :  { %v263_v2 = vunpack.c.l.bf16 %v262_v0  ;;  %v267_v3 = vunpack.c.l.bf16 %v269_v1  ;;  %v264_v4 = vunpack.c.h.bf16 %v262_v0  ;;  %v268_v5 = vunpack.c.h.bf16 %v269_v1  ;;  %v282_v30 = vld [vmem:[%s382_s1] sm:$0xff]   ;;  %v283_v31 = vld [vmem:[%s382_s1 + $0x8] sm:$0xff]  }
   0x3   :  { %274 = vmatprep.subr.bf16.mxu0 %v282_v30  ;;  %v242_v46 = vld [vmem:[%s383_s2] ss:$0 sm:$0xff] }
   0x4   :  { %v30_v6 = vsel %vm29_vm0, %v263_v2, 0.0  ;;  %v36_v7 = vsel %vm29_vm0, %v267_v3, 0.0  ;;  %v33_v8 = vsel %vm29_vm0, %v264_v4, 0.0  ;;  %v39_v9 = vsel %vm29_vm0, %v268_v5, 0.0  ;;  %275 = vmatpush3.bf16.msra.mxu0 %v282_v30  ;;  %v243_v52 = vld [vmem:[%s384_s3] ss:$0 sm:$0xff] }
   0x5   :  { %31 = vadd.xlane.f32.xlu0 %v30_v6  ;;  %37 = vadd.xlane.f32.xlu1 %v36_v7  ;;  %v244_v0 = vld [vmem:[%s385_s4] ss:$0 sm:$0xff] }
   0x6   :  { %276 = vmatprep.subr.bf16.mxu0 %v283_v31 }
   0x8   :  { %277 = vmatpush3.bf16.msra.mxu0 %v283_v31 }
   0x9   :  { %34 = vadd.xlane.f32.xlu0 %v33_v8  ;;  %40 = vadd.xlane.f32.xlu1 %v39_v9 }
  0x92   :  { %v32_v10 = vpop.xlane.xlu0 %31  ;;  %v38_v11 = vpop.xlane.xlu1 %37 }
  0x93   :  { %v43_v12 = vmul.f32 0.03125, %v32_v10  ;;  %v45_v13 = vmul.f32 0.03125, %v38_v11 }
  0x95   :  { %v47_v14 = vsub.f32 %v263_v2, %v43_v12  ;;  %v49_v15 = vsub.f32 %v267_v3, %v45_v13 }
  0x96   :  { %v35_v16 = vpop.xlane.xlu0 %34  ;;  %v41_v17 = vpop.xlane.xlu1 %40 }
  0x97   :  { %v44_v18 = vmul.f32 0.03125, %v35_v16  ;;  %v46_v19 = vmul.f32 0.03125, %v41_v17  ;;  %v51_v20 = vmul.f32 %v47_v14, %v47_v14  ;;  %v53_v21 = vmul.f32 %v49_v15, %v49_v15 }
  0x99   :  { %v48_v22 = vsub.f32 %v264_v4, %v44_v18  ;;  %v50_v23 = vsub.f32 %v268_v5, %v46_v19  ;;  %v55_v24 = vsel %vm29_vm0, %v51_v20, 0.0  ;;  %v61_v25 = vsel %vm29_vm0, %v53_v21, 0.0 }
  0x9a   :  { %56 = vadd.xlane.f32.xlu0 %v55_v24 }
  0x9b   :  { %v52_v26 = vmul.f32 %v48_v22, %v48_v22  ;;  %v54_v27 = vmul.f32 %v50_v23, %v50_v23 }
  0x9d   :  { %v58_v28 = vsel %vm29_vm0, %v52_v26, 0.0  ;;  %v64_v29 = vsel %vm29_vm0, %v54_v27, 0.0 }
  0x9e   :  { %62 = vadd.xlane.f32.xlu0 %v61_v25  ;;  %59 = vadd.xlane.f32.xlu1 %v58_v28 }
  0xa2   :  { %65 = vadd.xlane.f32.xlu1 %v64_v29 }
 0x127   :  { %v57_v32 = vpop.xlane.xlu0 %56 }
 0x128   :  { %v67_v33 = vmul.f32 0.03125, %v57_v32 }
 0x12a   :  { %v71_v34 = vadd.f32 1e-05, %v67_v33 }
 0x12b   :  { %v60_v35 = vpop.xlane.xlu1 %59  ;;  %v63_v36 = vpop.xlane.xlu0 %62 }
 0x12c   :  { %284 = vrsqrt.f32 %v71_v34  ;;  %v68_v37 = vmul.f32 0.03125, %v60_v35  ;;  %v69_v38 = vmul.f32 0.03125, %v63_v36 }
 0x12e   :  { %v72_v39 = vadd.f32 1e-05, %v68_v37  ;;  %v73_v40 = vadd.f32 1e-05, %v69_v38 }
 0x12f   :  { %v66_v41 = vpop.xlane.xlu1 %65 }
 0x130   :  { %286 = vrsqrt.f32 %v72_v39  ;;  %v70_v42 = vmul.f32 0.03125, %v66_v41 }
 0x131   :  { %288 = vrsqrt.f32 %v73_v40 }
 0x132   :  { %v74_v43 = vadd.f32 1e-05, %v70_v42 }
 0x134   :  { %290 = vrsqrt.f32 %v74_v43 }
 0x136   :  { %v285_v44 = vpop.eup %284 }
 0x137   :  { %v79_v45 = vmul.f32 %v285_v44, %v47_v14 }
 0x139   :  { %v90_v50 = vmul.f32 %v242_v46, %v79_v45 }
 0x13a   :  { %v287_v47 = vpop.eup %286 }
 0x13b   :  { %v289_v48 = vpop.eup %288  ;;  %v80_v49 = vmul.f32 %v287_v47, %v48_v22  ;;  %v101_v56 = vadd.f32 %v243_v52, %v90_v50 }
 0x13c   :  { %v81_v51 = vmul.f32 %v289_v48, %v49_v15 }
 0x13d   :  { %v91_v53 = vmul.f32 %v242_v46, %v80_v49 }
 0x13e   :  { %v291_v54 = vpop.eup %290  ;;  %v92_v58 = vmul.f32 %v242_v46, %v81_v51 }
 0x13f   :  { %v82_v55 = vmul.f32 %v291_v54, %v50_v23  ;;  %v102_v57 = vadd.f32 %v243_v52, %v91_v53 }
 0x140   :  { %v103_v61 = vadd.f32 %v243_v52, %v92_v58 }
 0x141   :  { %v105_v59 = vpack.c.bf16 %v102_v57, %v101_v56  ;;  %v93_v60 = vmul.f32 %v242_v46, %v82_v55 }
 0x143   :  { %278 = vmatprep.mubr.msk.bf16.mxu0 %vm29_vm0, %v105_v59  ;;  %v104_v62 = vadd.f32 %v243_v52, %v93_v60 }
 0x145   :  { %v106_v63 = vpack.c.bf16 %v104_v62, %v103_v61 }
 0x147   :  { %279 = vmatmul.mubr.msk.bf16.vlgmr.msra.gmra.mrb[0].mxu0 %vm29_vm0, %v106_v63 }
 0x21a   :  { %v280_v1 = vpop.f32.mrb[0].mxu0 }
 0x21b   :  { %v179_v2 = vadd.f32 %v280_v1, %v244_v0  ;;  %v170_v3 = vpop.f32.mrb[1].mxu0 }
 0x21c   :  { %v171_v4 = vadd.f32 %v244_v0, %v170_v3  ;;  %v281_v5 = vpop.f32.mrb[2].mxu0 }
 0x21d   :  { %v251_v6 = vmul.f32 -1.702, %v179_v2  ;;  %v182_v7 = vadd.f32 %v281_v5, %v244_v0  ;;  %v173_v8 = vpop.f32.mrb[3].mxu0 }
 0x21e   :  { %v249_v9 = vmul.f32 -1.702, %v171_v4  ;;  %v174_v10 = vadd.f32 %v244_v0, %v173_v8 }
 0x21f   :  { %v197_v11 = vmul.f32 1.442695, %v251_v6  ;;  %v252_v12 = vmul.f32 -1.702, %v182_v7 }
 0x220   :  { %v193_v13 = vmul.f32 1.442695, %v249_v9  ;;  %v250_v14 = vmul.f32 -1.702, %v174_v10 }
 0x221   :  { %292 = vpow2.f32 %v197_v11  ;;  %v199_v15 = vmul.f32 1.442695, %v252_v12 }
 0x222   :  { %294 = vpow2.f32 %v193_v13  ;;  %v195_v16 = vmul.f32 1.442695, %v250_v14 }
 0x223   :  { %296 = vpow2.f32 %v199_v15 }
 0x224   :  { %298 = vpow2.f32 %v195_v16 }
 0x22b   :  { %v293_v17 = vpop.eup %292 }
 0x22c   :  { %v295_v18 = vpop.eup %294  ;;  %v203_v19 = vadd.f32 1.0, %v293_v17 }
 0x22d   :  { %v297_v20 = vpop.eup %296  ;;  %v201_v21 = vadd.f32 1.0, %v295_v18 }
 0x22e   :  { %v299_v22 = vpop.eup %298  ;;  %300 = vrcp.f32 %v203_v19  ;;  %v204_v23 = vadd.f32 1.0, %v297_v20 }
 0x22f   :  { %302 = vrcp.f32 %v201_v21  ;;  %v202_v24 = vadd.f32 1.0, %v299_v22 }
 0x230   :  { %304 = vrcp.f32 %v204_v23 }
 0x231   :  { %306 = vrcp.f32 %v202_v24 }
 0x238   :  { %v301_v25 = vpop.eup %300 }
 0x239   :  { %v303_v26 = vpop.eup %302  ;;  %v215_v27 = vmul.f32 %v301_v25, %v179_v2 }
 0x23a   :  { %v305_v28 = vpop.eup %304  ;;  %v213_v29 = vmul.f32 %v303_v26, %v171_v4 }
 0x23b   :  { %v307_v30 = vpop.eup %306  ;;  %v259_v31 = vpack.c.bf16 %v215_v27, %v215_v27  ;;  %v216_v32 = vmul.f32 %v305_v28, %v182_v7 }
 0x23c   :  { %v257_v33 = vpack.c.bf16 %v213_v29, %v213_v29  ;;  %v214_v34 = vmul.f32 %v307_v30, %v174_v10 }
 0x23d   :  { %236 = vst.msk [vmem:[%s386_s5 + $0x8] sm:$0xf] %vm233_vm1, %v259_v31  ;;  %v260_v35 = vpack.c.bf16 %v216_v32, %v216_v32 }
 0x23e   :  { %234 = vst.msk [vmem:[%s386_s5] sm:$0xf] %vm233_vm1, %v257_v33  ;;  %v258_v36 = vpack.c.bf16 %v214_v34, %v214_v34 }
 0x23f   :  { %237 = vst.msk [vmem:[%s386_s5 + $0xc] sm:$0xf] %vm233_vm1, %v260_v35 }
 0x240   :  { %235 = vst.msk [vmem:[%s386_s5 + $0x4] sm:$0xf] %vm233_vm1, %v258_v36 }

// kernel: clip_model_forward.19
= control target key start
LH: loop header
LB: loop body
LE: loop exit
PB: predicated region body
PF: predicated region fallthrough
CT: control target
= control target key end

     0   :  { %vm71_vm0 = vcmask 523264   ;;  %vm155_vm1 = vcmask 257024   ;;  %s278_s1 = inlined_call_operand.vmem [shape: bf16[64,32], index: 1, kind: input, shape index: {}]   ;;  %s279_s0 = inlined_call_operand.vmem [shape: bf16[32,64], index: 0, kind: input, shape index: {}]   ;;  %s280_s3 = inlined_call_operand.vmem [shape: bf16[32,32], index: 3, kind: input, shape index: {}]   ;;  %s281_s2 = inlined_call_operand.vmem [shape: f32[1,32], index: 2, kind: input, shape index: {}]   ;;  %s282_s4 = inlined_call_operand.vmem [shape: bf16[32,32], index: 4, kind: output, shape index: {}]  }
   0x1   :  { %v208_v0 = vld [vmem:[%s278_s1] sm:$0xff]   ;;  %v209_v1 = vld [vmem:[%s278_s1 + $0x8] sm:$0xff]   ;;  %v210_v2 = vld [vmem:[%s278_s1 + $0x10] sm:$0xff]  }
   0x2   :  { %196 = vmatprep.subr.bf16.mxu0 %v208_v0  ;;  %v212_v3 = vld [vmem:[%s279_s0] sm:$0xff]   ;;  %v211_v4 = vld [vmem:[%s278_s1 + $0x18] sm:$0xff]   ;;  %v213_v5 = vld [vmem:[%s279_s0 + $0x8] sm:$0xff]  }
   0x3   :  { %197 = vmatpush3.bf16.msra.mxu0 %v208_v0  ;;  %204 = vmatprep.mubr.msk.bf16.mxu0 %vm71_vm0, %v212_v3  ;;  %v189_v6 = vld [vmem:[%s280_s3 + $0x8] sm:$0xff]   ;;  %v182_v7 = vld [vmem:[%s280_s3] sm:$0xff]  }
   0x4   :  { %198 = vmatprep.subr.bf16.mxu0 %v209_v1  ;;  %v164_v8 = vld [vmem:[%s281_s2] ss:$0 sm:$0xff]  ;;  %v187_v9 = vunpack.c.l.bf16 %v189_v6  ;;  %v183_v11 = vunpack.c.l.bf16 %v182_v7  ;;  %v188_v14 = vunpack.c.h.bf16 %v189_v6  ;;  %v184_v17 = vunpack.c.h.bf16 %v182_v7 }
   0x7   :  { %199 = vmatpush3.bf16.msra.mxu0 %v209_v1 }
   0x8   :  { %200 = vmatprep.subr.bf16.mxu0 %v210_v2 }
   0xb   :  { %201 = vmatpush3.bf16.msra.mxu0 %v210_v2 }
   0xc   :  { %202 = vmatprep.subr.bf16.mxu0 %v211_v4 }
   0xf   :  { %203 = vmatpush3.bf16.msra.mxu0 %v211_v4 }
  0x12   :  { %205 = vmatmul.mubr.msk.bf16.vlgmr.msra.gmra.mrb[0].mxu0 %vm71_vm0, %v213_v5 }
  0xe5   :  { %v206_v10 = vpop.f32.mrb[0].mxu0 }
  0xe6   :  { %v121_v12 = vadd.f32 %v206_v10, %v164_v8  ;;  %v112_v13 = vpop.f32.mrb[1].mxu0 }
  0xe7   :  { %v113_v15 = vadd.f32 %v164_v8, %v112_v13  ;;  %v207_v16 = vpop.f32.mrb[2].mxu0 }
  0xe8   :  { %v137_v18 = vadd.f32 %v187_v9, %v121_v12  ;;  %v124_v19 = vadd.f32 %v207_v16, %v164_v8  ;;  %v115_v20 = vpop.f32.mrb[3].mxu0 }
  0xe9   :  { %v135_v21 = vadd.f32 %v183_v11, %v113_v15  ;;  %v116_v22 = vadd.f32 %v164_v8, %v115_v20 }
  0xea   :  { %v179_v23 = vpack.c.bf16 %v137_v18, %v137_v18  ;;  %v138_v24 = vadd.f32 %v188_v14, %v124_v19 }
  0xeb   :  { %v177_v25 = vpack.c.bf16 %v135_v21, %v135_v21  ;;  %v136_v26 = vadd.f32 %v184_v17, %v116_v22 }
  0xec   :  { %158 = vst.msk [vmem:[%s282_s4 + $0x8] sm:$0xf] %vm155_vm1, %v179_v23  ;;  %v180_v27 = vpack.c.bf16 %v138_v24, %v138_v24 }
  0xed   :  { %156 = vst.msk [vmem:[%s282_s4] sm:$0xf] %vm155_vm1, %v177_v25  ;;  %v178_v28 = vpack.c.bf16 %v136_v26, %v136_v26 }
  0xee   :  { %159 = vst.msk [vmem:[%s282_s4 + $0xc] sm:$0xf] %vm155_vm1, %v180_v27 }
  0xef   :  { %157 = vst.msk [vmem:[%s282_s4 + $0x4] sm:$0xf] %vm155_vm1, %v178_v28 }

// kernel: clip_model_forward.25
= control target key start
LH: loop header
LB: loop body
LE: loop exit
PB: predicated region body
PF: predicated region fallthrough
CT: control target
= control target key end

     0   :  { %v143_v1 = vmov 0.0   ;;  %vm144_vm0 = vmmov 0   ;;  %s190_s0 = inlined_call_operand.vmem [shape: bf16[2,32], index: 0, kind: input, shape index: {}]   ;;  %s191_s1 = inlined_call_operand.vmem [shape: bf16[32,128], index: 1, kind: input, shape index: {}]   ;;  %s192_s2 = inlined_call_operand.vmem [shape: f32[1,128], index: 2, kind: input, shape index: {}]   ;;  %s193_s3 = inlined_call_operand.hbm [shape: f32[2,128], index: 3, kind: output, shape index: {}]  }
   0x1   :  { %v117_v0 = vld [vmem:[%s191_s1] sm:$0xff]   ;;  %106 = vmatprep.subr.bf16.mxu0 %v143_v1  ;;  %v118_v2 = vld [vmem:[%s191_s1 + $0x8] sm:$0xff]   ;;  %110 = vmatprep.mubr.msk.bf16.mxu0 %vm144_vm0, %v143_v1 }
   0x2   :  { %107 = vmatpush3.bf16.msra.mxu0 %v117_v0 }
   0x3   :  { %108 = vmatprep.subr.bf16.mxu0 %v143_v1 }
   0x4   :  { %8 = vsyncpa [#allocation3], 0  ;;  %v16_v3 = vld [vmem:[%s190_s0] sm:$0x1]  ;;  %vm40_vm1 = vcmask 261120   ;;  %s145_s20 = smov [#allocation2]  }
   0x5   :  { %v99_v4 = vld [vmem:[%s192_s2] ss:$0 sm:$0xff]  ;;  %s91_s21 = sshll.u32 %s145_s20, 4  ;;  %s92_s21 = int_to_ptr.vmem [resolvable:$true] %s91_s21 }
   0x6   :  { %109 = vmatpush3.bf16.msra.mxu0 %v118_v2  ;;  %s119_s1 = scalar_lea.vmem %s92_s21, 32  ;;  %p124_p1 = scmp.lt.s32.totalorder %s92_s21, %s92_s21 }
   0x7   :  { %p120_p0 = scmp.ne.s32.totalorder %s92_s21, %s119_s1  ;;  %p125_p2 = scmp.lt.s32.totalorder %s119_s1, %s119_s1 }
   0x9   :  { %111 = vmatmul.mubr.msk.bf16.vlgmr.msra.gmra.mrb[0].mxu0 %vm40_vm1, %v16_v3  ;;  %p126_p3 = por %p125_p2, %p124_p1 }
   0xb   :  { %p127_p4 = pnand %p126_p3, %p120_p0 }
  0xdc   :  { %v78_v5 = vpop.f32.mrb[0].mxu0 }
  0xdd   :  { %v79_v6 = vadd.f32 %v99_v4, %v78_v5  ;;  %v112_v7 = vpop.f32.mrb[1].mxu0 }
  0xde   :  { %v81_v8 = vpop.f32.mrb[2].mxu0 }
  0xdf   :  { %84 = vst [vmem:[#allocation2] sm:$0x3] %v79_v6  ;;  %v113_v9 = vpop.f32.mrb[3].mxu0 }
  0xe0   :  { %130 = shalt.err (!%p127_p4)
}
  0xe1   :  { %s131_s2 = scalar_lea.hbm %s193_s3, 32 }
  0xe2   :  { %p132_p5 = scmp.ne.s32.totalorder %s193_s3, %s131_s2  ;;  %p135_p6 = scmp.lt.u32.totalorder %s131_s2, %s193_s3 }
  0xe4   :  { %p137_p7 = pnand %p135_p6, %p132_p5 }
  0xe6   :  { %140 = shalt.err (!%p137_p7)
}
  0xe7   :  { %94 = dma.vmem_to_hbm [thread:$0]  %s92_s21, 32, %s193_s3, [#allocation3]  }
  0xe8   :  { %141 = dma.done.wait [#allocation3], 32  }
  0xe9   :  { %142 = vsyncadd [#allocation3], 4294967264 }
  0xea   :  { %98 = vsyncpa [#allocation3], 1 }

</bundles_post_ra>
